<compile_context>
chip_gen: v6e
topology: v6e:2x2x1
jax: 0.10.0
libtpu: 0.0.40
codegen_flags: <defaults>
</compile_context>

<pallas_src>
import functools

import jax
import jax.numpy as jnp
from jax.experimental import pallas as pl
from jax.experimental.pallas import tpu as pltpu

_MXU_DTYPE = jnp.bfloat16   # MXU-native input dtype on v5e/v6e/v7x
_F32 = jnp.float32


def _vmem_budget_bytes():
    """~75% of physical VMEM: ~48 MiB on v7x (64 MiB/TC), ~96 MiB on v5e/v6e."""
    cap = 64 * 1024 * 1024  # assume the smallest generation if the query fails
    try:
        info = pltpu.get_tpu_info()
        cap = int(getattr(info, "vmem_capacity_bytes", cap) or cap)
    except Exception:
        pass
    return (cap * 3) // 4


def _pick_m_tile(m, prefs=(512, 256, 128, 64, 32, 16)):
    """Largest bf16-friendly (multiple-of-16) divisor of m that still leaves >= 2
    grid steps on the parallel M axis (keeps both v7x TensorCores busy)."""
    divisors = [t for t in prefs if m % t == 0]
    for t in divisors:
        if m // t >= 2:
            return t
    return divisors[0] if divisors else m


def _pick_tile(dim, prefs):
    for t in prefs:
        if dim >= t and dim % t == 0:
            return t
    return dim  # small / odd dim: use the full extent (legal per BlockSpec rules)


# ---------------------------------------------------------------------------
# Fused path: one pallas_call, grid over the batch axis only.  Both bf16 weight
# matrices stay VMEM-resident (constant index_map -> single HBM DMA each); the
# hidden activation lives entirely in VMEM/vregs.
# ---------------------------------------------------------------------------
def _fused_mlp_kernel(x_ref, w1_ref, b1_ref, w2_ref, b2_ref, o_ref):
    # Layer 1 on the MXU: bf16 inputs, f32 accumulation, f32 bias+ReLU epilogue.
    h = jnp.dot(x_ref[...].astype(_MXU_DTYPE), w1_ref[...],
                preferred_element_type=_F32)
    h = jnp.maximum(h + b1_ref[...], 0.0)
    # Layer 2 straight from the bf16-cast hidden tile (never written to HBM).
    y = jnp.dot(h.astype(_MXU_DTYPE), w2_ref[...], preferred_element_type=_F32)
    o_ref[...] = (y + b2_ref[...]).astype(o_ref.dtype)


def _mlp_fused(x, w1_t, b1, w2_t, b2, *, tm, vmem_limit):
    M, K = x.shape
    H = w1_t.shape[1]
    N = w2_t.shape[1]
    x_isz = jnp.dtype(x.dtype).itemsize
    w_isz = jnp.dtype(w1_t.dtype).itemsize
    cost = pl.CostEstimate(
        flops=2 * M * H * K + 2 * M * N * H + 3 * M * H + 2 * M * N,
        transcendentals=0,
        bytes_accessed=(M * K * x_isz + (K * H + H * N) * w_isz
                        + (H + N) * 4 + M * N * x_isz),
    )
    return pl.pallas_call(
        _fused_mlp_kernel,
        out_shape=jax.ShapeDtypeStruct((M, N), x.dtype),
        grid_spec=pltpu.PrefetchScalarGridSpec(
            num_scalar_prefetch=0,
            grid=(M // tm,),
            in_specs=[
                pl.BlockSpec((tm, K), lambda i: (i, 0)),   # x: streamed over M
                pl.BlockSpec((K, H), lambda i: (0, 0)),    # W1: resident, DMA'd once
                pl.BlockSpec((1, H), lambda i: (0, 0)),    # b1: resident
                pl.BlockSpec((H, N), lambda i: (0, 0)),    # W2: resident, DMA'd once
                pl.BlockSpec((1, N), lambda i: (0, 0)),    # b2: resident
            ],
            out_specs=pl.BlockSpec((tm, N), lambda i: (i, 0)),
        ),
        compiler_params=pltpu.CompilerParams(
            dimension_semantics=("parallel",),   # M tiles shard across v7x's 2 TCs
            vmem_limit_bytes=int(vmem_limit),
        ),
        cost_estimate=cost,
    )(x, w1_t, b1, w2_t, b2)


# ---------------------------------------------------------------------------
# Fallback path: tiled per-layer Linear (used when weights are too large to
# keep both layers resident in VMEM).
# ---------------------------------------------------------------------------
def _linear_kernel_acc(x_ref, w_ref, b_ref, o_ref, acc_ref, *, activation):
    k = pl.program_id(2)

    @pl.when(k == 0)
    def _init():
        acc_ref[...] = jnp.zeros_like(acc_ref)

    acc_ref[...] += jnp.dot(x_ref[...].astype(_MXU_DTYPE), w_ref[...],
                            preferred_element_type=_F32)

    @pl.when(k == pl.num_programs(2) - 1)
    def _finalize():
        y = acc_ref[...] + b_ref[...]
        if activation == "relu":
            y = jnp.maximum(y, 0.0)
        o_ref[...] = y.astype(o_ref.dtype)


def _linear_kernel_noacc(x_ref, w_ref, b_ref, o_ref, *, activation):
    # K fits in a single grid step: skip the accumulator scratch entirely
    # (no zero-init / += / acc->o copy; saves vst passes and tm*tn*4 B of VMEM).
    y = jnp.dot(x_ref[...].astype(_MXU_DTYPE), w_ref[...],
                preferred_element_type=_F32) + b_ref[...]
    if activation == "relu":
        y = jnp.maximum(y, 0.0)
    o_ref[...] = y.astype(o_ref.dtype)


def linear(x, w_t, b, *, activation=None, out_dtype=None, vmem_limit=None):
    """Tiled y = act(x @ w_t + b).  x: (M, K); w_t: (K, N); b: (1, N) f32."""
    M, K = x.shape
    Kw, N = w_t.shape
    assert K == Kw and b.shape == (1, N)
    out_dtype = out_dtype or x.dtype
    vmem_limit = vmem_limit or _vmem_budget_bytes()
    w_t = w_t if w_t.dtype == _MXU_DTYPE else w_t.astype(_MXU_DTYPE)

    # bf16-aware tiles: row tiles are multiples of 16 (sublane packing), lane
    # tiles are 256/512-class (v6e/v7x MXU) falling back to 128 (v5e); big K
    # tiles amortize the ~0.35 us/grid-step overhead and cut weight re-streams.
    tm = _pick_tile(M, (512, 256, 128, 64, 32, 16))
    tn = _pick_tile(N, (512, 256, 128))
    tk = _pick_tile(K, (1024, 512, 256, 128))
    grid = (M // tm, N // tn, K // tk)

    x_isz = jnp.dtype(x.dtype).itemsize
    cost = pl.CostEstimate(
        flops=2 * M * N * K + 2 * M * N,
        transcendentals=0,
        # Actual streamed traffic: x re-read once per N tile, W once per M tile.
        bytes_accessed=(M * K * x_isz * grid[1] + K * N * 2 * grid[0]
                        + N * 4 + M * N * jnp.dtype(out_dtype).itemsize),
    )

    single_k = grid[2] == 1
    kernel = functools.partial(
        _linear_kernel_noacc if single_k else _linear_kernel_acc,
        activation=activation)
    scratch = [] if single_k else [pltpu.VMEM((tm, tn), _F32)]

    return pl.pallas_call(
        kernel,
        out_shape=jax.ShapeDtypeStruct((M, N), out_dtype),
        grid_spec=pltpu.PrefetchScalarGridSpec(
            num_scalar_prefetch=0,
            grid=grid,
            in_specs=[
                pl.BlockSpec((tm, tk), lambda i, j, k: (i, k)),   # activations
                pl.BlockSpec((tk, tn), lambda i, j, k: (k, j)),   # weights (M-independent)
                pl.BlockSpec((1, tn), lambda i, j, k: (0, j)),    # bias (N-indexed only)
            ],
            out_specs=pl.BlockSpec((tm, tn), lambda i, j, k: (i, j)),
            scratch_shapes=scratch,
        ),
        compiler_params=pltpu.CompilerParams(
            dimension_semantics=("parallel", "parallel", "arbitrary"),
            vmem_limit_bytes=int(vmem_limit),
        ),
        cost_estimate=cost,
    )(x, w_t, b)


def mlp_forward(x, w1_t, b1, w2_t, b2):
    """relu(x @ W1^T + b1) @ W2^T + b2.  Fused single kernel when both bf16 weight
    matrices fit the generation-aware VMEM budget; otherwise two tiled kernels
    with a bf16 hidden activation."""
    M, K = x.shape
    H = w1_t.shape[1]
    N = w2_t.shape[1]
    budget = _vmem_budget_bytes()
    tm = _pick_m_tile(M)
    x_isz = jnp.dtype(x.dtype).itemsize
    fused_bytes = ((K * H + H * N) * 2        # resident bf16 weights
                   + (H + N) * 4              # resident f32 biases
                   + 2 * tm * K * x_isz       # double-buffered x tiles
                   + 2 * tm * N * x_isz       # double-buffered output tiles
                   + 2 * tm * H * 4)          # f32 hidden value + headroom
    if fused_bytes <= (budget * 4) // 5:
        return _mlp_fused(x, w1_t, b1, w2_t, b2, tm=tm, vmem_limit=budget)
    # TODO(synk): for very large D consider per-layer full-weight residency or
    # pl.Buffered(3) on the streaming weight spec if DMA waits show up in profiles.
    h = linear(x, w1_t, b1, activation="relu", out_dtype=_MXU_DTYPE, vmem_limit=budget)
    return linear(h, w2_t, b2, activation=None, out_dtype=x.dtype, vmem_limit=budget)


def init_params(key, dim, dtype=jnp.float32):
    # Mimics nn.Linear's uniform(-1/sqrt(in), 1/sqrt(in)) init.
    k1, k2, k3, k4 = jax.random.split(key, 4)
    bound = 1.0 / (dim ** 0.5)
    w1 = jax.random.uniform(k1, (dim, dim), dtype, -bound, bound)  # (out, in)
    b1 = jax.random.uniform(k2, (dim,), dtype, -bound, bound)
    w2 = jax.random.uniform(k3, (dim, dim), dtype, -bound, bound)  # (out, in)
    b2 = jax.random.uniform(k4, (dim,), dtype, -bound, bound)
    # Pre-transpose to (in, out) and pre-cast weights to bf16 in HBM (bf16-native
    # MXU; halves weight HBM traffic and VMEM residency).  Biases stay f32 for the
    # f32 epilogue (safe on v5e, which has no bf16 VPU).
    return (w1.T.astype(_MXU_DTYPE), b1.reshape(1, dim),
            w2.T.astype(_MXU_DTYPE), b2.reshape(1, dim))


if __name__ == "__main__":
    B, D = 128, 512  # module default dim=512; small batch, tm=64 -> grid=(2,)
    key = jax.random.PRNGKey(0)
    kx, kp = jax.random.split(key)
    x = jax.random.normal(kx, (B, D), jnp.float32)
    w1_t, b1, w2_t, b2 = init_params(kp, D)

    out = jax.jit(mlp_forward)(x, w1_t, b1, w2_t, b2)
    jax.block_until_ready(out)

    # Plain-JAX reference mirroring the kernel's bf16-input / f32-accumulate numerics.
    xf = x.astype(jnp.bfloat16).astype(jnp.float32)
    w1f = w1_t.astype(jnp.float32)
    w2f = w2_t.astype(jnp.float32)
    h_ref = jnp.maximum(xf @ w1f + b1, 0.0).astype(jnp.bfloat16).astype(jnp.float32)
    ref = h_ref @ w2f + b2

    assert out.shape == (B, D)
    assert jnp.allclose(out, ref, atol=2e-2, rtol=2e-2)

    print("KERNEL_OK")
</pallas_src>

<mosaic_0001>
module attributes {stable_mosaic.version = 11 : i64} {
  func.func @_fused_mlp_kernel(%arg0: i32, %arg1: memref<64x512xf32, #tpu.memory_space<vmem>>, %arg2: memref<512x512xbf16, #tpu.memory_space<vmem>>, %arg3: memref<1x512xf32, #tpu.memory_space<vmem>>, %arg4: memref<512x512xbf16, #tpu.memory_space<vmem>>, %arg5: memref<1x512xf32, #tpu.memory_space<vmem>>, %arg6: memref<64x512xf32, #tpu.memory_space<vmem>>) attributes {dimension_semantics = [#tpu.dimension_semantics<parallel>], iteration_bounds = array<i64: 2>, scalar_prefetch = 0 : i64, scratch_operands = 0 : i64, tpu.core_type = #tpu.core_type<tc>, window_params = [{transform_indices = @transform_0, window_bounds = array<i64: 64, 512>}, {pipeline_mode = #tpu.pipeline_mode<synchronous>, transform_indices = @transform_1, window_bounds = array<i64: 512, 512>}, {pipeline_mode = #tpu.pipeline_mode<synchronous>, transform_indices = @transform_2, window_bounds = array<i64: 1, 512>}, {pipeline_mode = #tpu.pipeline_mode<synchronous>, transform_indices = @transform_3, window_bounds = array<i64: 512, 512>}, {pipeline_mode = #tpu.pipeline_mode<synchronous>, transform_indices = @transform_4, window_bounds = array<i64: 1, 512>}, {transform_indices = @transform_5, window_bounds = array<i64: 64, 512>}]} {
    %c0 = arith.constant 0 : index
    %c0_0 = arith.constant 0 : index
    %0 = vector.load %arg1[%c0, %c0_0] : memref<64x512xf32, #tpu.memory_space<vmem>>, vector<64x512xf32>
    %1 = arith.truncf %0 : vector<64x512xf32> to vector<64x512xbf16>
    %c0_1 = arith.constant 0 : index
    %c0_2 = arith.constant 0 : index
    %2 = vector.load %arg2[%c0_1, %c0_2] : memref<512x512xbf16, #tpu.memory_space<vmem>>, vector<512x512xbf16>
    %cst = arith.constant dense<0.000000e+00> : vector<64x512xf32>
    %3 = tpu.matmul %1, %2, %cst {dimension_numbers = #tpu.dot_dimension_numbers<[1], [0], [0], [1], [0, 0, 1, 1], [], []>} : vector<64x512xbf16>, vector<512x512xbf16>, vector<64x512xf32> -> vector<64x512xf32>
    %c0_3 = arith.constant 0 : index
    %c0_4 = arith.constant 0 : index
    %4 = vector.load %arg3[%c0_3, %c0_4] : memref<1x512xf32, #tpu.memory_space<vmem>>, vector<1x512xf32>
    %5 = vector.broadcast %4 : vector<1x512xf32> to vector<64x512xf32>
    %6 = arith.addf %3, %5 : vector<64x512xf32>
    %cst_5 = arith.constant 0.000000e+00 : f32
    %7 = vector.broadcast %cst_5 : f32 to vector<64x512xf32>
    %8 = arith.maximumf %6, %7 : vector<64x512xf32>
    %9 = arith.truncf %8 : vector<64x512xf32> to vector<64x512xbf16>
    %c0_6 = arith.constant 0 : index
    %c0_7 = arith.constant 0 : index
    %10 = vector.load %arg4[%c0_6, %c0_7] : memref<512x512xbf16, #tpu.memory_space<vmem>>, vector<512x512xbf16>
    %cst_8 = arith.constant dense<0.000000e+00> : vector<64x512xf32>
    %11 = tpu.matmul %9, %10, %cst_8 {dimension_numbers = #tpu.dot_dimension_numbers<[1], [0], [0], [1], [0, 0, 1, 1], [], []>} : vector<64x512xbf16>, vector<512x512xbf16>, vector<64x512xf32> -> vector<64x512xf32>
    %c0_9 = arith.constant 0 : index
    %c0_10 = arith.constant 0 : index
    %12 = vector.load %arg5[%c0_9, %c0_10] : memref<1x512xf32, #tpu.memory_space<vmem>>, vector<1x512xf32>
    %13 = vector.broadcast %12 : vector<1x512xf32> to vector<64x512xf32>
    %14 = arith.addf %11, %13 : vector<64x512xf32>
    %c0_11 = arith.constant 0 : index
    %c0_12 = arith.constant 0 : index
    %15 = vector.load %arg6[%c0_11, %c0_12] : memref<64x512xf32, #tpu.memory_space<vmem>>, vector<64x512xf32>
    tpu.vector_store %arg6[%c0_11, %c0_12], %14 {strides = array<i32>} : memref<64x512xf32, #tpu.memory_space<vmem>>, vector<64x512xf32>,
    return
  }
  func.func @transform_0(%arg0: i32) -> (i32, i32) {
    %c0_i32 = arith.constant 0 : i32
    %c0_i32_0 = arith.constant 0 : i32
    return %arg0, %c0_i32 : i32, i32
  }
  func.func @transform_1(%arg0: i32) -> (i32, i32) {
    %c0_i32 = arith.constant 0 : i32
    %c0_i32_0 = arith.constant 0 : i32
    %c0_i32_1 = arith.constant 0 : i32
    return %c0_i32, %c0_i32_0 : i32, i32
  }
  func.func @transform_2(%arg0: i32) -> (i32, i32) {
    %c0_i32 = arith.constant 0 : i32
    %c0_i32_0 = arith.constant 0 : i32
    %c0_i32_1 = arith.constant 0 : i32
    return %c0_i32, %c0_i32_0 : i32, i32
  }
  func.func @transform_3(%arg0: i32) -> (i32, i32) {
    %c0_i32 = arith.constant 0 : i32
    %c0_i32_0 = arith.constant 0 : i32
    %c0_i32_1 = arith.constant 0 : i32
    return %c0_i32, %c0_i32_0 : i32, i32
  }
  func.func @transform_4(%arg0: i32) -> (i32, i32) {
    %c0_i32 = arith.constant 0 : i32
    %c0_i32_0 = arith.constant 0 : i32
    %c0_i32_1 = arith.constant 0 : i32
    return %c0_i32, %c0_i32_0 : i32, i32
  }
  func.func @transform_5(%arg0: i32) -> (i32, i32) {
    %c0_i32 = arith.constant 0 : i32
    %c0_i32_0 = arith.constant 0 : i32
    return %arg0, %c0_i32 : i32, i32
  }
}

</mosaic_0001>

<bundles_post_ra>
// kernel: mlp_forward.1
= control target key start
LH: loop header
LB: loop body
LE: loop exit
PB: predicated region body
PF: predicated region fallthrough
CT: control target
= control target key end

     0   :  { %10 = vsyncpa [#allocation3], 0  ;;  %s4177_s0 = inlined_call_operand.hbm [shape: f32[128,512], index: 0, kind: input, shape index: {}]   ;;  %s4178_s1 = inlined_call_operand.hbm [shape: bf16[512,512], index: 1, kind: input, shape index: {}]   ;;  %s4179_s2 = inlined_call_operand.hbm [shape: f32[1,512], index: 2, kind: input, shape index: {}]   ;;  %s4180_s3 = inlined_call_operand.hbm [shape: bf16[512,512], index: 3, kind: input, shape index: {}]   ;;  %s4181_s4 = inlined_call_operand.vmem [shape: f32[1,512], index: 4, kind: input, shape index: {}]   ;;  %s4182_s5 = inlined_call_operand.hbm [shape: f32[128,512], index: 5, kind: output, shape index: {}]  }
   0x1   :  { %12 = vsyncpa [#allocation3 + $0x1], 0 }
   0x2   :  { %13 = vsyncpa [#allocation6], 0 }
   0x3   :  { %14 = vsyncpa [#allocation9], 0 }
   0x4   :  { %15 = vsyncpa [#allocation4], 0 }
   0x5   :  { %17 = vsyncpa [#allocation4 + $0x1], 0  ;;  %s3667_s18 = smov 0   ;;  %s3669_s19 = smov 0  }
   0x6   :  { %s3671_s20 = smov 0   ;;  %s3673_s21 = smov 0  }
   0x7 LB: > { %s3688_s22 = sadd.s32 4294967295, %s3624_s21   ;;  %s2697_s23 = sadd.s32 4294967294, %s3624_s21   ;;  %s3624_s21 = sphi %s3673_s21, %s4206_s21   ;;  %s3620_s20 = sphi %s3671_s20, %s4205_s20   ;;  %s3616_s19 = sphi %s3669_s19, %s4204_s19   ;;  %s3612_s18 = sphi %s3667_s18, %s4203_s18  }
   0x8   : > { %p43_p0 = scmp.ne.s32.totalorder %s3616_s19, %s3612_s18  ;;  %p4183_p1 = scmp.eq.s32.totalorder %s3688_s22, 0 }
   0x9   : > { %p157_p3 = scmp.eq.s32.totalorder %s2697_s23, 1  ;;  %p2698_p5 = scmp.ge.s32.totalorder %s3624_s21, 1 }
   0xa   : > { %p3697_p4 = por %p4183_p1, %p43_p0  ;;  %p164_p7 = scmp.lt.s32.totalorder %s3624_s21, 3 }
   0xb   : > { %p3702_p6 = por %p157_p3, %p43_p0  ;;  %s3626_s27 = smov [#allocation5]  }
   0xc   : > { %s4187_s24 = scalar_select %p3697_p4, 1, 0 }
   0xd   : > { %s4188_s25 = scalar_select %p3702_p6, 1, 0 }
   0xe   : > { %p3707_p8 = pnand %p2698_p5, %p164_p7  ;;  %s176_s28 = sshll.u32 %s3626_s27, 4  ;;  %s177_s28 = int_to_ptr.vmem [resolvable:$true] %s176_s28 }
   0xf   : > { %s3627_s30 = smov [#allocation7]   ;;  %s3628_s7 = smov [#allocation8]  }
  0x10   : > { %s4189_s26 = scalar_select %p3707_p8, 1, 0 }
  0x11   : > { %p2995_p9 = pneg %p3707_p8  ;;  %s190_s6 = sshll.u32 %s3627_s30, 4  ;;  %s191_s6 = int_to_ptr.vmem [resolvable:$true] %s190_s6 }
  0x12   : > { %s200_s8 = sshll.u32 %s3628_s7, 4  ;;  %s3457_s9 = scalar_lea.vmem %s177_s28, 16384  ;;  %s201_s8 = int_to_ptr.vmem [resolvable:$true] %s200_s8 }
  0x13   : > { %p3716_p11 = pnand %p2995_p9, %p4183_p1  ;;  %p3458_p13 = scmp.ne.s32.totalorder %s177_s28, %s3457_s9 }
  0x14   : > { %p3465_p5 = scmp.lt.s32.totalorder %s177_s28, %s177_s28  ;;  %p3466_p7 = scmp.lt.s32.totalorder %s3457_s9, %s3457_s9 }
  0x15   : > { %p3448_p12 = pneg %p3716_p11 }
  0x16   : > { %p3467_p9 = por %p3466_p7, %p3465_p5 }
  0x17   : > { %p3460_p0 = pnand %p3458_p13, %p3448_p12 }
  0x19   : > { %p3461_p3 = pneg %p3460_p0 }
  0x1b   : > { %p3468_p10 = pnand %p3467_p9, %p3461_p3 }
  0x1d   : > { %3471 = shalt.err (!%p3468_p10)
}
  0x1e   : > { %s3629_s10 = smov 256   ;;  %s3630_s11 = smov 16  }
  0x1f   : > { %2998 = dma.hbm_to_vmem [thread:$0]  (!%p3716_p11), %s4178_s1, 16384, %s177_s28, [#allocation6], %s3629_s10, %s3629_s10, %s3630_s11  }
  0x20   : > { %s3483_s14 = scalar_lea.vmem %s191_s6, 64  ;;  %p3491_p2 = scmp.lt.s32.totalorder %s191_s6, %s191_s6 }
  0x21   : > { %p3484_p1 = scmp.ne.s32.totalorder %s191_s6, %s3483_s14  ;;  %p3492_p6 = scmp.lt.s32.totalorder %s3483_s14, %s3483_s14 }
  0x23   : > { %p3486_p13 = pnand %p3484_p1, %p3448_p12  ;;  %p3493_p5 = por %p3492_p6, %p3491_p2 }
  0x25   : > { %p3487_p0 = pneg %p3486_p13 }
  0x27   : > { %p3494_p3 = pnand %p3493_p5, %p3487_p0 }
  0x29   : > { %3497 = shalt.err (!%p3494_p3)
}
  0x2a   : > { %3001 = dma.hbm_to_vmem [thread:$0]  (!%p3716_p11), %s4179_s2, 64, %s191_s6, [#allocation6]  }
  0x2b   : > { %s3509_s17 = scalar_lea.vmem %s201_s8, 16384  ;;  %p3517_p9 = scmp.lt.s32.totalorder %s201_s8, %s201_s8 }
  0x2c   : > { %p3510_p10 = scmp.ne.s32.totalorder %s201_s8, %s3509_s17  ;;  %p3518_p13 = scmp.lt.s32.totalorder %s3509_s17, %s3509_s17 }
  0x2e   : > { %p3512_p7 = pnand %p3510_p10, %p3448_p12  ;;  %p3519_p4 = por %p3518_p13, %p3517_p9 }
  0x30   : > { %p3513_p1 = pneg %p3512_p7 }
  0x32   : > { %p3520_p2 = pnand %p3519_p4, %p3513_p1 }
  0x34   : > { %3523 = shalt.err (!%p3520_p2)
}
  0x35   : > { %3004 = dma.hbm_to_vmem [thread:$0]  (!%p3716_p11), %s4180_s3, 16384, %s201_s8, [#allocation9], %s3629_s10, %s3629_s10, %s3630_s11  }
  0x36   : > { %s3747_s28 = sadd.s32 1, %s3624_s21   ;;  %s30_s29 = sadd.s32 1, %s3620_s20 }
  0x37   : > { %s27_s30 = ssub.s32 %s3624_s21, %s3747_s28  ;;  %p37_p6 = scmp.ne.s32.totalorder %s3620_s20, %s3616_s19 }
  0x38   : > { %p28_p4 = scmp.eq.s32.totalorder %s27_s30, 0  ;;  %p38_p12 = scmp.eq.s32.totalorder %s3624_s21, 0 }
  0x39   : > { %p3016_p0 = scmp.lt.s32.totalorder %s3624_s21, 2  ;;  %p4191_p3 = scmp.eq.s32.totalorder %s3688_s22, 1 }
  0x3a   : > { %s3757_s6 = scalar_select %p28_p4, %s3620_s20, %s30_s29  }
  0x3b   : > { %p39_p5 = por %p38_p12, %p37_p6  ;;  %p3761_p10 = por %p4191_p3, %p37_p6 }
  0x3c   : > { %s217_s9 = sand.u32 1, %s3620_s20   ;;  %s2976_s12 = sshll.u32 %s3624_s21, 12 }
  0x3d   : > { %s4192_s7 = scalar_select %p3761_p10, 1, 0 }
  0x3e   : > { %s2703_s8 = sshll.u32 %s217_s9, 8  ;;  %s3770_s13 = scalar_lea.hbm %s4177_s0, %s2976_s12 }
  0x3f   : > { %s221_s14 = scalar_lea.vmem [#allocation2], %s2703_s8  ;;  %p3772_p11 = pnand %p3016_p0, %p39_p5 }
  0x40   : > { %s229_s15 = sshll.u32 %s221_s14, 4  ;;  %s3778_s17 = scalar_lea.sflag [#allocation3], %s217_s9  ;;  %s3776_s15 = int_to_ptr.vmem [resolvable:$true] %s229_s15 }
  0x41   : > { %s3524_s23 = scalar_lea.hbm %s3770_s13, 4096  ;;  %p3526_p1 = pneg %p3772_p11 }
  0x42   : > { %p3525_p7 = scmp.ne.s32.totalorder %s3770_s13, %s3524_s23  ;;  %s3529_s29 = scalar_lea.hbm %s4177_s0, 8192 }
  0x43   : > { %p3530_p2 = scmp.lt.s32.totalorder %s3770_s13, %s4177_s0  ;;  %p3531_p4 = scmp.lt.s32.totalorder %s3529_s29, %s3524_s23 }
  0x44   : > { %p3527_p9 = pnand %p3526_p1, %p3525_p7 }
  0x45   : > { %p3532_p6 = por %p3531_p4, %p3530_p2 }
  0x46   : > { %p3528_p13 = pneg %p3527_p9 }
  0x48   : > { %p3533_p12 = pnand %p3532_p6, %p3528_p13 }
  0x4a   : > { %3536 = shalt.err (!%p3533_p12)
}
  0x4b   : > { %s3537_s9 = scalar_lea.vmem %s3776_s15, 4096  ;;  %s3631_s10 = smov [#allocation2]  }
  0x4c   : > { %p3538_p0 = scmp.ne.s32.totalorder %s3776_s15, %s3537_s9  ;;  %s3542_s11 = sshll.u32 %s3631_s10, 4  ;;  %s3543_s11 = int_to_ptr.vmem [resolvable:$false] %s3542_s11 }
  0x4d   : > { %s3544_s14 = scalar_lea.vmem %s3543_s11, 8192  ;;  %p3545_p7 = scmp.lt.s32.totalorder %s3776_s15, %s3543_s11 }
  0x4e   : > { %p3540_p5 = pnand %p3538_p0, %p3526_p1  ;;  %p3546_p9 = scmp.lt.s32.totalorder %s3544_s14, %s3537_s9 }
  0x50   : > { %p3541_p3 = pneg %p3540_p5  ;;  %p3547_p10 = por %p3546_p9, %p3545_p7 }
  0x52   : > { %p3548_p8 = pnand %p3547_p10, %p3541_p3 }
  0x54   : > { %3551 = shalt.err (!%p3548_p8)
}
  0x55   : > { %s3632_s23 = smov 512   ;;  %s3633_s27 = smov 32  }
  0x56   : > { %3008 = dma.hbm_to_vmem [thread:$0]  (!%p3772_p11), %s3770_s13, 4096, %s3776_s15, %s3778_s17, %s3632_s23, %s3632_s23, %s3633_s27  }
  0x57   : > { %p4194_p1 = scmp.ne.s32.totalorder %s4189_s26, 0 }
  0x58   : > { %s3802_s30 = sand.u32 (!%p4194_p1), 1, %s3616_s19   ;;  %p4195_p8 = scmp.ne.s32.totalorder (!%p4194_p1), %s4187_s24, 0 }
  0x59   : > { %241 = sbr.rel (%p4194_p1) target bundleno = 741 (0x2e5), region = 40  ;;  %s2708_s29 = sshll.u32 (!%p4194_p1), %s3802_s30, 8 }
  0x5a   : > { %s244_s12 = scalar_lea.sflag (!%p4194_p1), [#allocation3], %s3802_s30  ;;  %s3808_s8 = scalar_lea.vmem (!%p4194_p1), [#allocation2], %s2708_s29 }
  0x5e   : > { %3595 = dma.done.wait (%p4195_p8), %s244_s12, 4096  }
  0x5f   : > { %3597 = vsyncadd (%p4195_p8), %s244_s12, 4294963200  ;;  %p4196_p10 = scmp.eq.s32.totalorder %s3688_s22, 0 }
  0x61   : > { %3599 = dma.done.wait (%p4196_p10), [#allocation6], 16448   ;;  %p4197_p11 = pmov %p4196_p10 }
  0x62   : > { %p4198_p13 = pmov %p4196_p10 }
  0x63   : > { %3601 = vsyncadd (%p4197_p11), [#allocation6], 4294950848 }
  0x64   : > { %3603 = dma.done.wait (%p4198_p13), [#allocation9], 16384   ;;  %p4199_p2 = pmov %p4196_p10 }
  0x65   : > { %v3062_v0 = vld [vmem:[#allocation5 + $0xe4] ss:$16 sps:$4 sm:$0xff]   ;;  %v3066_v2 = vld [vmem:[#allocation5 + $0xe0] ss:$16 sps:$4 sm:$0xff]   ;;  %v289_v46 = vld [vmem:[%s3808_s8 + $0x8] sm:$0xff]  ;;  %s4054_s13 = scalar_lea.vmem [#allocation10], %s2708_s29 }
  0x66   : > { %3605 = vsyncadd (%p4199_p2), [#allocation9], 4294950912  ;;  %v3064_v1 = vld [vmem:[#allocation5 + $0x2e4] ss:$16 sps:$4 sm:$0xff]   ;;  %1126 = vmatprep.subr.bf16.mxu0 %v3062_v0  ;;  %v3067_v3 = vld [vmem:[#allocation5 + $0x2e0] ss:$16 sps:$4 sm:$0xff]  }
  0x67   : > { %1199 = vmatprep.subr.bf16.mxu1 %v3064_v1  ;;  %v3068_v4 = vld [vmem:[#allocation5 + $0xc4] ss:$16 sps:$4 sm:$0xff]   ;;  %1127 = vmatpush1.bf16.msra.mxu0 %v3066_v2  ;;  %v3072_v6 = vld [vmem:[#allocation5 + $0xc0] ss:$16 sps:$4 sm:$0xff]   ;;  %v293_v47 = vld [vmem:[%s3808_s8 + $0x28] sm:$0xff]  ;;  %s2978_s15 = sshll.u32 %s3688_s22, 12 }
  0x68   : > { %1200 = vmatpush1.bf16.msra.mxu1 %v3067_v3  ;;  %v3070_v5 = vld [vmem:[#allocation5 + $0x2c4] ss:$16 sps:$4 sm:$0xff]   ;;  %1128 = vmatprep.subr.bf16.mxu0 %v3068_v4  ;;  %v3073_v7 = vld [vmem:[#allocation5 + $0x2c0] ss:$16 sps:$4 sm:$0xff]   ;;  %v291_v48 = vld [vmem:[%s3808_s8 + $0x18] sm:$0xff]  ;;  %v3826_v53 = vpack.c.bf16 %v293_v47, %v289_v46  ;;  %s2595_s16 = sshll.u32 %s4054_s13, 4  ;;  %s4130_s10 = scalar_lea.hbm %s4182_s5, %s2978_s15  ;;  %s4132_s16 = int_to_ptr.vmem [resolvable:$true] %s2595_s16 }
  0x69   : > { %1201 = vmatprep.subr.bf16.mxu1 %v3070_v5  ;;  %v3074_v8 = vld [vmem:[#allocation5 + $0xa4] ss:$16 sps:$4 sm:$0xff]   ;;  %v3078_v10 = vld [vmem:[#allocation5 + $0xa0] ss:$16 sps:$4 sm:$0xff]   ;;  %v295_v49 = vld [vmem:[%s3808_s8 + $0x38] sm:$0xff]  ;;  %s2581_s22 = scalar_lea.sflag [#allocation4], %s3802_s30 }
  0x6a   : > { %v3076_v9 = vld [vmem:[#allocation5 + $0x2a4] ss:$16 sps:$4 sm:$0xff]   ;;  %v3079_v11 = vld [vmem:[#allocation5 + $0x2a0] ss:$16 sps:$4 sm:$0xff]   ;;  %v3828_v54 = vpack.c.bf16 %v295_v49, %v291_v48  ;;  %1158 = vmatprep.mubr.bf16.mxu0 %v3826_v53  ;;  %v3184_v48 = vld [vmem:[#allocation5 + $0x6c] ss:$16 sps:$4 sm:$0xff]  }
  0x6b   : > { %1129 = vmatpush1.bf16.msra.mxu0 %v3072_v6  ;;  %v3080_v12 = vld [vmem:[#allocation5 + $0x84] ss:$16 sps:$4 sm:$0xff]   ;;  %v3084_v14 = vld [vmem:[#allocation5 + $0x80] ss:$16 sps:$4 sm:$0xff]   ;;  %s3552_s11 = scalar_lea.vmem %s4132_s16, 4096  ;;  %p4200_p6 = scmp.ne.s32.totalorder %s4192_s7, 0 }
  0x6c   : > { %1202 = vmatpush1.bf16.msra.mxu1 %v3073_v7  ;;  %1130 = vmatprep.subr.bf16.mxu0 %v3074_v8  ;;  %v3082_v13 = vld [vmem:[#allocation5 + $0x284] ss:$16 sps:$4 sm:$0xff]   ;;  %v3085_v15 = vld [vmem:[#allocation5 + $0x280] ss:$16 sps:$4 sm:$0xff]   ;;  %p3553_p4 = scmp.ne.s32.totalorder %s4132_s16, %s3552_s11  ;;  %s3634_s14 = smov [#allocation10]  }
  0x6d   : > { %1203 = vmatprep.subr.bf16.mxu1 %v3076_v9  ;;  %v3086_v16 = vld [vmem:[#allocation5 + $0x64] ss:$16 sps:$4 sm:$0xff]   ;;  %v3090_v18 = vld [vmem:[#allocation5 + $0x60] ss:$16 sps:$4 sm:$0xff]   ;;  %1231 = vmatprep.mubr.bf16.mxu1 %v3828_v54  ;;  %s3556_s23 = sshll.u32 %s3634_s14, 4  ;;  %s3557_s23 = int_to_ptr.vmem [resolvable:$false] %s3556_s23 }
  0x6e   : > { %v3088_v17 = vld [vmem:[#allocation5 + $0x264] ss:$16 sps:$4 sm:$0xff]   ;;  %v3091_v19 = vld [vmem:[#allocation5 + $0x260] ss:$16 sps:$4 sm:$0xff]   ;;  %p3554_p12 = pnand %p3553_p4, %p4200_p6  ;;  %s3558_s27 = scalar_lea.vmem %s3557_s23, 8192 }
  0x6f   : > { %1131 = vmatpush1.bf16.msra.mxu0 %v3078_v10  ;;  %v3092_v20 = vld [vmem:[#allocation5 + $0x44] ss:$16 sps:$4 sm:$0xff]   ;;  %v3096_v22 = vld [vmem:[#allocation5 + $0x40] ss:$16 sps:$4 sm:$0xff]   ;;  %v3160_v10 = vld [vmem:[#allocation5 + $0xec] ss:$16 sps:$4 sm:$0xff]   ;;  %p3559_p5 = scmp.lt.s32.totalorder %s4132_s16, %s3557_s23  ;;  %p3560_p3 = scmp.lt.s32.totalorder %s3558_s27, %s3552_s11 }
  0x70   : > { %1204 = vmatpush1.bf16.msra.mxu1 %v3079_v11  ;;  %1132 = vmatprep.subr.bf16.mxu0 %v3080_v12  ;;  %v3094_v21 = vld [vmem:[#allocation5 + $0x244] ss:$16 sps:$4 sm:$0xff]   ;;  %v3097_v23 = vld [vmem:[#allocation5 + $0x240] ss:$16 sps:$4 sm:$0xff]   ;;  %v3163_v11 = vld [vmem:[#allocation5 + $0x2ec] ss:$16 sps:$4 sm:$0xff]   ;;  %p3555_p0 = pneg %p3554_p12 }
  0x71   : > { %1205 = vmatprep.subr.bf16.mxu1 %v3082_v13  ;;  %v3098_v24 = vld [vmem:[#allocation5 + $0x24] ss:$16 sps:$4 sm:$0xff]   ;;  %v3102_v26 = vld [vmem:[#allocation5 + $0x20] ss:$16 sps:$4 sm:$0xff]   ;;  %v3158_v12 = vld [vmem:[#allocation5 + $0xe8] ss:$16 sps:$4 sm:$0xff]   ;;  %p3561_p7 = por %p3560_p3, %p3559_p5 }
  0x72   : > { %v3100_v25 = vld [vmem:[#allocation5 + $0x224] ss:$16 sps:$4 sm:$0xff]   ;;  %v3103_v27 = vld [vmem:[#allocation5 + $0x220] ss:$16 sps:$4 sm:$0xff]   ;;  %v3161_v13 = vld [vmem:[#allocation5 + $0x2e8] ss:$16 sps:$4 sm:$0xff]  }
  0x73   : > { %1133 = vmatpush1.bf16.msra.mxu0 %v3084_v14  ;;  %v3104_v28 = vld [vmem:[#allocation5 + $0x4] ss:$16 sps:$4 sm:$0xff]   ;;  %v3108_v30 = vld [vmem:[#allocation5] ss:$16 sps:$4 sm:$0xff]   ;;  %v297_v14 = vld [vmem:[%s3808_s8 + $0x48] sm:$0xff]  ;;  %p3562_p9 = pnand %p3561_p7, %p3555_p0 }
  0x74   : > { %1206 = vmatpush1.bf16.msra.mxu1 %v3085_v15  ;;  %1134 = vmatprep.subr.bf16.mxu0 %v3086_v16  ;;  %v3106_v29 = vld [vmem:[#allocation5 + $0x204] ss:$16 sps:$4 sm:$0xff]   ;;  %v3109_v31 = vld [vmem:[#allocation5 + $0x200] ss:$16 sps:$4 sm:$0xff]  }
  0x75   : > { %1207 = vmatprep.subr.bf16.mxu1 %v3088_v17  ;;  %v3110_v32 = vld [vmem:[#allocation5 + $0x1e4] ss:$16 sps:$4 sm:$0xff]   ;;  %v3114_v34 = vld [vmem:[#allocation5 + $0x1e0] ss:$16 sps:$4 sm:$0xff]   ;;  %v301_v17 = vld [vmem:[%s3808_s8 + $0x68] sm:$0xff] }
  0x76   : > { %v3112_v33 = vld [vmem:[#allocation5 + $0x3e4] ss:$16 sps:$4 sm:$0xff]   ;;  %v3115_v35 = vld [vmem:[#allocation5 + $0x3e0] ss:$16 sps:$4 sm:$0xff]  }
  0x77   : > { %1135 = vmatpush1.bf16.msra.mxu0 %v3090_v18  ;;  %v3116_v36 = vld [vmem:[#allocation5 + $0x1c4] ss:$16 sps:$4 sm:$0xff]   ;;  %v3120_v38 = vld [vmem:[#allocation5 + $0x1c0] ss:$16 sps:$4 sm:$0xff]   ;;  %v299_v18 = vld [vmem:[%s3808_s8 + $0x58] sm:$0xff] }
  0x78   : > { %1208 = vmatpush1.bf16.msra.mxu1 %v3091_v19  ;;  %1136 = vmatprep.subr.bf16.mxu0 %v3092_v20  ;;  %v3118_v37 = vld [vmem:[#allocation5 + $0x3c4] ss:$16 sps:$4 sm:$0xff]   ;;  %v3121_v39 = vld [vmem:[#allocation5 + $0x3c0] ss:$16 sps:$4 sm:$0xff]   ;;  %v303_v19 = vld [vmem:[%s3808_s8 + $0x78] sm:$0xff] }
  0x79   : > { %1209 = vmatprep.subr.bf16.mxu1 %v3094_v21  ;;  %v3122_v40 = vld [vmem:[#allocation5 + $0x1a4] ss:$16 sps:$4 sm:$0xff]   ;;  %v3126_v42 = vld [vmem:[#allocation5 + $0x1a0] ss:$16 sps:$4 sm:$0xff]   ;;  %v3166_v20 = vld [vmem:[#allocation5 + $0xcc] ss:$16 sps:$4 sm:$0xff]  }
  0x7a   : > { %v3124_v41 = vld [vmem:[#allocation5 + $0x3a4] ss:$16 sps:$4 sm:$0xff]   ;;  %v3127_v43 = vld [vmem:[#allocation5 + $0x3a0] ss:$16 sps:$4 sm:$0xff]   ;;  %v3169_v21 = vld [vmem:[#allocation5 + $0x2cc] ss:$16 sps:$4 sm:$0xff]  }
  0x7b   : > { %1137 = vmatpush1.bf16.msra.mxu0 %v3096_v22  ;;  %v3128_v44 = vld [vmem:[#allocation5 + $0x184] ss:$16 sps:$4 sm:$0xff]   ;;  %v3132_v50 = vld [vmem:[#allocation5 + $0x180] ss:$16 sps:$4 sm:$0xff]   ;;  %v3164_v22 = vld [vmem:[#allocation5 + $0xc8] ss:$16 sps:$4 sm:$0xff]  }
  0x7c   : > { %1210 = vmatpush1.bf16.msra.mxu1 %v3097_v23  ;;  %1138 = vmatprep.subr.bf16.mxu0 %v3098_v24  ;;  %v3130_v45 = vld [vmem:[#allocation5 + $0x384] ss:$16 sps:$4 sm:$0xff]   ;;  %v3133_v51 = vld [vmem:[#allocation5 + $0x380] ss:$16 sps:$4 sm:$0xff]   ;;  %v3167_v23 = vld [vmem:[#allocation5 + $0x2c8] ss:$16 sps:$4 sm:$0xff]   ;;  %v3844_v24 = vpack.c.bf16 %v301_v17, %v297_v14 }
  0x7d   : > { %1211 = vmatprep.subr.bf16.mxu1 %v3100_v25  ;;  %v3134_v52 = vld [vmem:[#allocation5 + $0x164] ss:$16 sps:$4 sm:$0xff]   ;;  %v3138_v56 = vld [vmem:[#allocation5 + $0x160] ss:$16 sps:$4 sm:$0xff]   ;;  %v3202_v14 = vld [vmem:[#allocation5 + $0xc] ss:$16 sps:$4 sm:$0xff]  }
  0x7e   : > { %v3136_v55 = vld [vmem:[#allocation5 + $0x364] ss:$16 sps:$4 sm:$0xff]   ;;  %v3139_v57 = vld [vmem:[#allocation5 + $0x360] ss:$16 sps:$4 sm:$0xff]   ;;  %v3205_v17 = vld [vmem:[#allocation5 + $0x20c] ss:$16 sps:$4 sm:$0xff]  }
  0x7f   : > { %1139 = vmatpush1.bf16.msra.mxu0 %v3102_v26  ;;  %v3140_v58 = vld [vmem:[#allocation5 + $0x144] ss:$16 sps:$4 sm:$0xff]   ;;  %v3144_v60 = vld [vmem:[#allocation5 + $0x140] ss:$16 sps:$4 sm:$0xff]   ;;  %v3847_v26 = vpack.c.bf16 %v303_v19, %v299_v18  ;;  %v3200_v18 = vld [vmem:[#allocation5 + $0x8] ss:$16 sps:$4 sm:$0xff]  }
  0x80   : > { %1212 = vmatpush1.bf16.msra.mxu1 %v3103_v27  ;;  %1140 = vmatprep.subr.bf16.mxu0 %v3104_v28  ;;  %v3142_v59 = vld [vmem:[#allocation5 + $0x344] ss:$16 sps:$4 sm:$0xff]   ;;  %v3145_v61 = vld [vmem:[#allocation5 + $0x340] ss:$16 sps:$4 sm:$0xff]   ;;  %v3172_v28 = vld [vmem:[#allocation5 + $0xac] ss:$16 sps:$4 sm:$0xff]  }
  0x81   : > { %1213 = vmatprep.subr.bf16.mxu1 %v3106_v29  ;;  %v3146_v62 = vld [vmem:[#allocation5 + $0x124] ss:$16 sps:$4 sm:$0xff]   ;;  %v3150_v0 = vld [vmem:[#allocation5 + $0x120] ss:$16 sps:$4 sm:$0xff]   ;;  %v3203_v19 = vld [vmem:[#allocation5 + $0x208] ss:$16 sps:$4 sm:$0xff]  }
  0x82   : > { %v3148_v63 = vld [vmem:[#allocation5 + $0x324] ss:$16 sps:$4 sm:$0xff]   ;;  %v3151_v1 = vld [vmem:[#allocation5 + $0x320] ss:$16 sps:$4 sm:$0xff]  }
  0x83   : > { %1141 = vmatpush1.bf16.msra.mxu0 %v3108_v30  ;;  %v3152_v2 = vld [vmem:[#allocation5 + $0x104] ss:$16 sps:$4 sm:$0xff]   ;;  %v3156_v4 = vld [vmem:[#allocation5 + $0x100] ss:$16 sps:$4 sm:$0xff]  }
  0x84   : > { %1214 = vmatpush1.bf16.msra.mxu1 %v3109_v31  ;;  %1142 = vmatprep.subr.bf16.mxu0 %v3110_v32  ;;  %v3154_v3 = vld [vmem:[#allocation5 + $0x304] ss:$16 sps:$4 sm:$0xff]   ;;  %v3157_v5 = vld [vmem:[#allocation5 + $0x300] ss:$16 sps:$4 sm:$0xff]   ;;  %v3175_v31 = vld [vmem:[#allocation5 + $0x2ac] ss:$16 sps:$4 sm:$0xff]  }
  0x85   : > { %1215 = vmatprep.subr.bf16.mxu1 %v3112_v33  ;;  %v288_v6 = vld [vmem:[%s3808_s8] sm:$0xff]  ;;  %v290_v8 = vld [vmem:[%s3808_s8 + $0x10] sm:$0xff]  ;;  %v3170_v32 = vld [vmem:[#allocation5 + $0xa8] ss:$16 sps:$4 sm:$0xff]  }
  0x86   : > { %v292_v7 = vld [vmem:[%s3808_s8 + $0x20] sm:$0xff]  ;;  %v294_v9 = vld [vmem:[%s3808_s8 + $0x30] sm:$0xff]  ;;  %v3173_v33 = vld [vmem:[#allocation5 + $0x2a8] ss:$16 sps:$4 sm:$0xff]  }
  0x87   : > { %1143 = vmatpush2.bf16.msra.mxu0 %v3114_v34  ;;  %v3837_v15 = vpack.c.bf16 %v292_v7, %v288_v6  ;;  %v3839_v16 = vpack.c.bf16 %v294_v9, %v290_v8  ;;  %v296_v25 = vld [vmem:[%s3808_s8 + $0x40] sm:$0xff]  ;;  %v298_v29 = vld [vmem:[%s3808_s8 + $0x50] sm:$0xff]  ;;  %v305_v34 = vld [vmem:[%s3808_s8 + $0x88] sm:$0xff] }
  0x88   : > { %1216 = vmatpush2.bf16.msra.mxu1 %v3115_v35  ;;  %1144 = vmatprep.subr.bf16.mxu0 %v3116_v36  ;;  %v300_v27 = vld [vmem:[%s3808_s8 + $0x60] sm:$0xff]  ;;  %v302_v30 = vld [vmem:[%s3808_s8 + $0x70] sm:$0xff]  ;;  %v3196_v6 = vld [vmem:[#allocation5 + $0x2c] ss:$16 sps:$4 sm:$0xff]  }
  0x89   : > { %1217 = vmatprep.subr.bf16.mxu1 %v3118_v37  ;;  %v3857_v35 = vpack.c.bf16 %v300_v27, %v296_v25  ;;  %v3859_v36 = vpack.c.bf16 %v302_v30, %v298_v29  ;;  %v309_v37 = vld [vmem:[%s3808_s8 + $0xa8] sm:$0xff]  ;;  %v308_v46 = vld [vmem:[%s3808_s8 + $0xa0] sm:$0xff]  ;;  %v306_v49 = vld [vmem:[%s3808_s8 + $0x90] sm:$0xff] }
  0x8a   : > { %v314_v7 = vld [vmem:[%s3808_s8 + $0xd0] sm:$0xff]  ;;  %v3199_v9 = vld [vmem:[#allocation5 + $0x22c] ss:$16 sps:$4 sm:$0xff]   ;;  %v3215_v29 = vld [vmem:[#allocation5 + $0x3c8] ss:$16 sps:$4 sm:$0xff]  }
  0x8b   : > { %1145 = vmatpush2.bf16.msra.mxu0 %v3120_v38  ;;  %v307_v38 = vld [vmem:[%s3808_s8 + $0x98] sm:$0xff]  ;;  %v318_v8 = vld [vmem:[%s3808_s8 + $0xf0] sm:$0xff] }
  0x8c   : > { %1218 = vmatpush2.bf16.msra.mxu1 %v3121_v39  ;;  %1146 = vmatprep.subr.bf16.mxu0 %v3122_v40  ;;  %v311_v39 = vld [vmem:[%s3808_s8 + $0xb8] sm:$0xff] }
  0x8d   : > { %1219 = vmatprep.subr.bf16.mxu1 %v3124_v41  ;;  %v3178_v40 = vld [vmem:[#allocation5 + $0x8c] ss:$16 sps:$4 sm:$0xff]   ;;  %v3868_v47 = vpack.c.bf16 %v311_v39, %v307_v38 }
  0x8e   : > { %v3181_v41 = vld [vmem:[#allocation5 + $0x28c] ss:$16 sps:$4 sm:$0xff]  }
  0x8f   : > { %1147 = vmatpush2.bf16.msra.mxu0 %v3126_v42  ;;  %v3176_v42 = vld [vmem:[#allocation5 + $0x88] ss:$16 sps:$4 sm:$0xff]   ;;  %v3214_v25 = vld [vmem:[#allocation5 + $0x1cc] ss:$16 sps:$4 sm:$0xff]  }
  0x90   : > { %1220 = vmatpush2.bf16.msra.mxu1 %v3127_v43  ;;  %1148 = vmatprep.subr.bf16.mxu0 %v3128_v44  ;;  %v3179_v43 = vld [vmem:[#allocation5 + $0x288] ss:$16 sps:$4 sm:$0xff]   ;;  %v3864_v44 = vpack.c.bf16 %v309_v37, %v305_v34  ;;  %v3217_v27 = vld [vmem:[#allocation5 + $0x3cc] ss:$16 sps:$4 sm:$0xff]  }
  0x91   : > { %1221 = vmatprep.subr.bf16.mxu1 %v3130_v45  ;;  %v304_v45 = vld [vmem:[%s3808_s8 + $0x80] sm:$0xff]  ;;  %v3220_v30 = vld [vmem:[#allocation5 + $0x1ac] ss:$16 sps:$4 sm:$0xff]   ;;  %v3224_v34 = vld [vmem:[#allocation5 + $0x188] ss:$16 sps:$4 sm:$0xff]  }
  0x92   : > { %v3227_v37 = vld [vmem:[#allocation5 + $0x388] ss:$16 sps:$4 sm:$0xff]   ;;  %v3232_v38 = vld [vmem:[#allocation5 + $0x16c] ss:$16 sps:$4 sm:$0xff]  }
  0x93   : > { %1149 = vmatpush2.bf16.msra.mxu0 %v3132_v50  ;;  %v310_v50 = vld [vmem:[%s3808_s8 + $0xb0] sm:$0xff]  ;;  %v3235_v39 = vld [vmem:[#allocation5 + $0x36c] ss:$16 sps:$4 sm:$0xff]  }
  0x94   : > { %1222 = vmatpush2.bf16.msra.mxu1 %v3133_v51  ;;  %1150 = vmatprep.subr.bf16.mxu0 %v3134_v52  ;;  %v3187_v51 = vld [vmem:[#allocation5 + $0x26c] ss:$16 sps:$4 sm:$0xff]   ;;  %v3182_v52 = vld [vmem:[#allocation5 + $0x68] ss:$16 sps:$4 sm:$0xff]  }
  0x95   : > { %1223 = vmatprep.subr.bf16.mxu1 %v3136_v55  ;;  %v3185_v55 = vld [vmem:[#allocation5 + $0x268] ss:$16 sps:$4 sm:$0xff]  }
  0x97   : > { %1151 = vmatpush2.bf16.msra.mxu0 %v3138_v56  ;;  %v313_v56 = vld [vmem:[%s3808_s8 + $0xc8] sm:$0xff] }
  0x98   : > { %1224 = vmatpush2.bf16.msra.mxu1 %v3139_v57  ;;  %1152 = vmatprep.subr.bf16.mxu0 %v3140_v58  ;;  %v317_v57 = vld [vmem:[%s3808_s8 + $0xe8] sm:$0xff]  ;;  %v3878_v58 = vpack.c.bf16 %v308_v46, %v304_v45 }
  0x99   : > { %1225 = vmatprep.subr.bf16.mxu1 %v3142_v59  ;;  %v3880_v59 = vpack.c.bf16 %v310_v50, %v306_v49  ;;  %v3236_v45 = vld [vmem:[#allocation5 + $0x148] ss:$16 sps:$4 sm:$0xff]   ;;  %v3247_v49 = vld [vmem:[#allocation5 + $0x32c] ss:$16 sps:$4 sm:$0xff]  }
  0x9a   : > { %v3239_v46 = vld [vmem:[#allocation5 + $0x348] ss:$16 sps:$4 sm:$0xff]  }
  0x9b   : > { %1153 = vmatpush2.bf16.msra.mxu0 %v3144_v60  ;;  %v315_v60 = vld [vmem:[%s3808_s8 + $0xd8] sm:$0xff] }
  0x9c   : > { %1226 = vmatpush2.bf16.msra.mxu1 %v3145_v61  ;;  %1154 = vmatprep.subr.bf16.mxu0 %v3146_v62  ;;  %v319_v61 = vld [vmem:[%s3808_s8 + $0xf8] sm:$0xff] }
  0x9d   : > { %1227 = vmatprep.subr.bf16.mxu1 %v3148_v63  ;;  %v3190_v62 = vld [vmem:[#allocation5 + $0x4c] ss:$16 sps:$4 sm:$0xff]   ;;  %v3242_v50 = vld [vmem:[#allocation5 + $0x128] ss:$16 sps:$4 sm:$0xff]  }
  0x9e   : > { %v3193_v63 = vld [vmem:[#allocation5 + $0x24c] ss:$16 sps:$4 sm:$0xff]  }
  0x9f   : > { %1155 = vmatpush2.bf16.msra.mxu0 %v3150_v0  ;;  %v3188_v0 = vld [vmem:[#allocation5 + $0x48] ss:$16 sps:$4 sm:$0xff]  }
  0xa0   : > { %1228 = vmatpush2.bf16.msra.mxu1 %v3151_v1  ;;  %1156 = vmatprep.subr.bf16.mxu0 %v3152_v2  ;;  %v3191_v1 = vld [vmem:[#allocation5 + $0x248] ss:$16 sps:$4 sm:$0xff]   ;;  %v3884_v2 = vpack.c.bf16 %v317_v57, %v313_v56 }
  0xa1   : > { %1229 = vmatprep.subr.bf16.mxu1 %v3154_v3  ;;  %v312_v3 = vld [vmem:[%s3808_s8 + $0xc0] sm:$0xff]  ;;  %v3248_v56 = vld [vmem:[#allocation5 + $0x108] ss:$16 sps:$4 sm:$0xff]  }
  0xa2   : > { %v3251_v57 = vld [vmem:[#allocation5 + $0x308] ss:$16 sps:$4 sm:$0xff]  }
  0xa3   : > { %1157 = vmatpush2.bf16.msra.mxu0 %v3156_v4  ;;  %v316_v4 = vld [vmem:[%s3808_s8 + $0xe0] sm:$0xff] }
  0xa4   : > { %1230 = vmatpush2.bf16.msra.mxu1 %v3157_v5  ;;  %1272 = vmatprep.subr.bf16.mxu0 %v3160_v10  ;;  %v3888_v5 = vpack.c.bf16 %v319_v61, %v315_v60  ;;  %v3896_v10 = vpack.c.bf16 %v316_v4, %v312_v3  ;;  %v3256_v60 = vld [vmem:[#allocation8 + $0xe4] ss:$16 sps:$4 sm:$0xff]   ;;  %v3254_v61 = vld [vmem:[#allocation8 + $0xe0] ss:$16 sps:$4 sm:$0xff]  }
  0xa5   : > { %1345 = vmatprep.subr.bf16.mxu1 %v3163_v11  ;;  %v3194_v11 = vld [vmem:[#allocation5 + $0x28] ss:$16 sps:$4 sm:$0xff]  }
  0xa6   : > { %1159 = vmatmul.mubr.bf16.vlgmr.msra.gmra.mxu0 %v3837_v15  ;;  %v3265_v3 = vld [vmem:[#allocation8 + $0x84] ss:$16 sps:$4 sm:$0xff]  }
  0xa7   : > { %1232 = vmatmul.mubr.bf16.vlgmr.msra.gmra.mxu1 %v3839_v16  ;;  %1273 = vmatpush1.bf16.msra.mxu0 %v3158_v12  ;;  %v3197_v12 = vld [vmem:[#allocation5 + $0x228] ss:$16 sps:$4 sm:$0xff]  }
  0xa8   : > { %1346 = vmatpush1.bf16.msra.mxu1 %v3161_v13  ;;  %1274 = vmatprep.subr.bf16.mxu0 %v3166_v20  ;;  %v3898_v13 = vpack.c.bf16 %v318_v8, %v314_v7  ;;  %v3208_v20 = vld [vmem:[#allocation5 + $0x1ec] ss:$16 sps:$4 sm:$0xff]   ;;  %v3271_v4 = vld [vmem:[#allocation8 + $0x44] ss:$16 sps:$4 sm:$0xff]   ;;  %v3272_v7 = vld [vmem:[#allocation8 + $0x20] ss:$16 sps:$4 sm:$0xff]  }
  0xa9   : > { %1347 = vmatprep.subr.bf16.mxu1 %v3169_v21  ;;  %1168 = vmatprep.mubr.bf16.mxu0 %v3844_v24  ;;  %v3211_v21 = vld [vmem:[#allocation5 + $0x3ec] ss:$16 sps:$4 sm:$0xff]   ;;  %v3316_v8 = vld [vmem:[#allocation8 + $0x2a4] ss:$16 sps:$4 sm:$0xff]  }
  0xaa   : > { %1241 = vmatprep.mubr.bf16.mxu1 %v3847_v26 }
  0xab   : > { %1275 = vmatpush1.bf16.msra.mxu0 %v3164_v22  ;;  %v3206_v22 = vld [vmem:[#allocation5 + $0x1e8] ss:$16 sps:$4 sm:$0xff]  }
  0xac   : > { %1348 = vmatpush1.bf16.msra.mxu1 %v3167_v23  ;;  %1276 = vmatprep.subr.bf16.mxu0 %v3172_v28  ;;  %v3209_v23 = vld [vmem:[#allocation5 + $0x3e8] ss:$16 sps:$4 sm:$0xff]  }
  0xad   : > { %1349 = vmatprep.subr.bf16.mxu1 %v3175_v31  ;;  %v3212_v28 = vld [vmem:[#allocation5 + $0x1c8] ss:$16 sps:$4 sm:$0xff]   ;;  %v3223_v31 = vld [vmem:[#allocation5 + $0x3ac] ss:$16 sps:$4 sm:$0xff]  }
  0xae   : > { %1169 = vmatmul.mubr.bf16.gmra.mxu0 %v3857_v35 }
  0xaf   : > { %1242 = vmatmul.mubr.bf16.gmra.mxu1 %v3859_v36  ;;  %1277 = vmatpush1.bf16.msra.mxu0 %v3170_v32  ;;  %v3218_v32 = vld [vmem:[#allocation5 + $0x1a8] ss:$16 sps:$4 sm:$0xff]  }
  0xb0   : > { %1350 = vmatpush1.bf16.msra.mxu1 %v3173_v33  ;;  %1278 = vmatprep.subr.bf16.mxu0 %v3178_v40  ;;  %v3229_v33 = vld [vmem:[#allocation5 + $0x38c] ss:$16 sps:$4 sm:$0xff]   ;;  %v3230_v40 = vld [vmem:[#allocation5 + $0x168] ss:$16 sps:$4 sm:$0xff]  }
  0xb1   : > { %1351 = vmatprep.subr.bf16.mxu1 %v3181_v41  ;;  %1178 = vmatprep.mubr.bf16.mxu0 %v3864_v44  ;;  %v3233_v41 = vld [vmem:[#allocation5 + $0x368] ss:$16 sps:$4 sm:$0xff]  }
  0xb2   : > { %1251 = vmatprep.mubr.bf16.mxu1 %v3868_v47 }
  0xb3   : > { %1279 = vmatpush1.bf16.msra.mxu0 %v3176_v42  ;;  %v3238_v42 = vld [vmem:[#allocation5 + $0x14c] ss:$16 sps:$4 sm:$0xff]  }
  0xb4   : > { %1352 = vmatpush1.bf16.msra.mxu1 %v3179_v43  ;;  %1280 = vmatprep.subr.bf16.mxu0 %v3184_v48  ;;  %v3241_v43 = vld [vmem:[#allocation5 + $0x34c] ss:$16 sps:$4 sm:$0xff]  }
  0xb5   : > { %1353 = vmatprep.subr.bf16.mxu1 %v3187_v51  ;;  %v3244_v48 = vld [vmem:[#allocation5 + $0x12c] ss:$16 sps:$4 sm:$0xff]   ;;  %v3245_v51 = vld [vmem:[#allocation5 + $0x328] ss:$16 sps:$4 sm:$0xff]  }
  0xb6   : > { %1179 = vmatmul.mubr.bf16.gmra.mxu0 %v3878_v58 }
  0xb7   : > { %1252 = vmatmul.mubr.bf16.gmra.mxu1 %v3880_v59  ;;  %1281 = vmatpush1.bf16.msra.mxu0 %v3182_v52  ;;  %v3250_v52 = vld [vmem:[#allocation5 + $0x10c] ss:$16 sps:$4 sm:$0xff]  }
  0xb8   : > { %1354 = vmatpush1.bf16.msra.mxu1 %v3185_v55  ;;  %1282 = vmatprep.subr.bf16.mxu0 %v3190_v62  ;;  %v3253_v55 = vld [vmem:[#allocation5 + $0x30c] ss:$16 sps:$4 sm:$0xff]   ;;  %v3259_v62 = vld [vmem:[#allocation8 + $0xc4] ss:$16 sps:$4 sm:$0xff]  }
  0xb9   : > { %1355 = vmatprep.subr.bf16.mxu1 %v3193_v63  ;;  %1188 = vmatprep.mubr.bf16.mxu0 %v3884_v2  ;;  %v3257_v63 = vld [vmem:[#allocation8 + $0xc0] ss:$16 sps:$4 sm:$0xff]  }
  0xba   : > { %1261 = vmatprep.mubr.bf16.mxu1 %v3888_v5 }
  0xbb   : > { %1283 = vmatpush1.bf16.msra.mxu0 %v3188_v0  ;;  %v3262_v0 = vld [vmem:[#allocation8 + $0xa4] ss:$16 sps:$4 sm:$0xff]  }
  0xbc   : > { %1356 = vmatpush1.bf16.msra.mxu1 %v3191_v1  ;;  %1284 = vmatprep.subr.bf16.mxu0 %v3196_v6  ;;  %v3260_v1 = vld [vmem:[#allocation8 + $0xa0] ss:$16 sps:$4 sm:$0xff]  }
  0xbd   : > { %1357 = vmatprep.subr.bf16.mxu1 %v3199_v9  ;;  %v3302_v6 = vld [vmem:[#allocation8 + $0x2e0] ss:$16 sps:$4 sm:$0xff]  }
  0xbe   : > { %1189 = vmatmul.mubr.bf16.gmra.mxu0 %v3896_v10  ;;  %v3314_v9 = vld [vmem:[#allocation8 + $0x2a0] ss:$16 sps:$4 sm:$0xff]  }
  0xbf   : > { %1262 = vmatmul.mubr.bf16.gmra.mxu1 %v3898_v13  ;;  %1285 = vmatpush1.bf16.msra.mxu0 %v3194_v11  ;;  %v3320_v11 = vld [vmem:[#allocation8 + $0x280] ss:$16 sps:$4 sm:$0xff]  }
  0xc0   : > { %1358 = vmatpush1.bf16.msra.mxu1 %v3197_v12  ;;  %1286 = vmatprep.subr.bf16.mxu0 %v3202_v14  ;;  %v3278_v12 = vld [vmem:[#allocation8 + $0x1e0] ss:$16 sps:$4 sm:$0xff]   ;;  %v3328_v14 = vld [vmem:[#allocation8 + $0x264] ss:$16 sps:$4 sm:$0xff]  }
  0xc1   : > { %1359 = vmatprep.subr.bf16.mxu1 %v3205_v17  ;;  %1304 = vmatprep.mubr.bf16.mxu0 %v3826_v53  ;;  %v3221_v53 = vld [vmem:[#allocation5 + $0x3a8] ss:$16 sps:$4 sm:$0xff]  }
  0xc2   : > { %1377 = vmatprep.mubr.bf16.mxu1 %v3828_v54  ;;  %v3226_v54 = vld [vmem:[#allocation5 + $0x18c] ss:$16 sps:$4 sm:$0xff]   ;;  %v3283_v17 = vld [vmem:[#allocation8 + $0x1c4] ss:$16 sps:$4 sm:$0xff]  }
  0xc3   : > { %1287 = vmatpush1.bf16.msra.mxu0 %v3200_v18  ;;  %v3326_v18 = vld [vmem:[#allocation8 + $0x260] ss:$16 sps:$4 sm:$0xff]  }
  0xc4   : > { %1360 = vmatpush1.bf16.msra.mxu1 %v3203_v19  ;;  %1288 = vmatprep.subr.bf16.mxu0 %v3208_v20  ;;  %v3286_v19 = vld [vmem:[#allocation8 + $0x1a4] ss:$16 sps:$4 sm:$0xff]   ;;  %v3332_v20 = vld [vmem:[#allocation8 + $0x240] ss:$16 sps:$4 sm:$0xff]  }
  0xc5   : > { %1361 = vmatprep.subr.bf16.mxu1 %v3211_v21  ;;  %v3284_v21 = vld [vmem:[#allocation8 + $0x1a0] ss:$16 sps:$4 sm:$0xff]  }
  0xc7   : > { %1289 = vmatpush2.bf16.msra.mxu0 %v3206_v22  ;;  %v3340_v22 = vld [vmem:[#allocation8 + $0x224] ss:$16 sps:$4 sm:$0xff]  }
  0xc8   : > { %1362 = vmatpush2.bf16.msra.mxu1 %v3209_v23  ;;  %1290 = vmatprep.subr.bf16.mxu0 %v3214_v25  ;;  %v3289_v23 = vld [vmem:[#allocation8 + $0x184] ss:$16 sps:$4 sm:$0xff]   ;;  %v3338_v25 = vld [vmem:[#allocation8 + $0x220] ss:$16 sps:$4 sm:$0xff]  }
  0xc9   : > { %1363 = vmatprep.subr.bf16.mxu1 %v3217_v27  ;;  %v3346_v27 = vld [vmem:[#allocation8 + $0x204] ss:$16 sps:$4 sm:$0xff]  }
  0xcb   : > { %1291 = vmatpush2.bf16.msra.mxu0 %v3212_v28  ;;  %v3287_v28 = vld [vmem:[#allocation8 + $0x180] ss:$16 sps:$4 sm:$0xff]  }
  0xcc   : > { %1364 = vmatpush2.bf16.msra.mxu1 %v3215_v29  ;;  %1292 = vmatprep.subr.bf16.mxu0 %v3220_v30  ;;  %v3344_v29 = vld [vmem:[#allocation8 + $0x200] ss:$16 sps:$4 sm:$0xff]   ;;  %v3292_v30 = vld [vmem:[#allocation8 + $0x164] ss:$16 sps:$4 sm:$0xff]  }
  0xcd   : > { %1365 = vmatprep.subr.bf16.mxu1 %v3223_v31  ;;  %v3352_v31 = vld [vmem:[#allocation8 + $0x3e4] ss:$16 sps:$4 sm:$0xff]  }
  0xcf   : > { %1293 = vmatpush2.bf16.msra.mxu0 %v3218_v32  ;;  %v3290_v32 = vld [vmem:[#allocation8 + $0x160] ss:$16 sps:$4 sm:$0xff]  }
  0xd0   : > { %1366 = vmatpush2.bf16.msra.mxu1 %v3221_v53  ;;  %1294 = vmatprep.subr.bf16.mxu0 %v3226_v54  ;;  %v3350_v53 = vld [vmem:[#allocation8 + $0x3e0] ss:$16 sps:$4 sm:$0xff]   ;;  %v3295_v54 = vld [vmem:[#allocation8 + $0x144] ss:$16 sps:$4 sm:$0xff]  }
  0xd1   : > { %1367 = vmatprep.subr.bf16.mxu1 %v3229_v33  ;;  %v3358_v33 = vld [vmem:[#allocation8 + $0x3c4] ss:$16 sps:$4 sm:$0xff]  }
  0xd3   : > { %1295 = vmatpush2.bf16.msra.mxu0 %v3224_v34  ;;  %v3293_v34 = vld [vmem:[#allocation8 + $0x140] ss:$16 sps:$4 sm:$0xff]  }
  0xd4   : > { %1368 = vmatpush2.bf16.msra.mxu1 %v3227_v37  ;;  %1296 = vmatprep.subr.bf16.mxu0 %v3232_v38  ;;  %v3356_v37 = vld [vmem:[#allocation8 + $0x3c0] ss:$16 sps:$4 sm:$0xff]   ;;  %v3298_v38 = vld [vmem:[#allocation8 + $0x124] ss:$16 sps:$4 sm:$0xff]  }
  0xd5   : > { %1369 = vmatprep.subr.bf16.mxu1 %v3235_v39  ;;  %v3364_v39 = vld [vmem:[#allocation8 + $0x3a4] ss:$16 sps:$4 sm:$0xff]  }
  0xd7   : > { %1297 = vmatpush2.bf16.msra.mxu0 %v3230_v40  ;;  %v3296_v40 = vld [vmem:[#allocation8 + $0x120] ss:$16 sps:$4 sm:$0xff]  }
  0xd8   : > { %1370 = vmatpush2.bf16.msra.mxu1 %v3233_v41  ;;  %1298 = vmatprep.subr.bf16.mxu0 %v3238_v42  ;;  %v3362_v41 = vld [vmem:[#allocation8 + $0x3a0] ss:$16 sps:$4 sm:$0xff]   ;;  %v3301_v42 = vld [vmem:[#allocation8 + $0x104] ss:$16 sps:$4 sm:$0xff]  }
  0xd9   : > { %1371 = vmatprep.subr.bf16.mxu1 %v3241_v43  ;;  %v3370_v43 = vld [vmem:[#allocation8 + $0x384] ss:$16 sps:$4 sm:$0xff]  }
  0xdb   : > { %1299 = vmatpush2.bf16.msra.mxu0 %v3236_v45  ;;  %v3299_v45 = vld [vmem:[#allocation8 + $0x100] ss:$16 sps:$4 sm:$0xff]  }
  0xdc   : > { %1372 = vmatpush2.bf16.msra.mxu1 %v3239_v46  ;;  %1300 = vmatprep.subr.bf16.mxu0 %v3244_v48  ;;  %v3368_v46 = vld [vmem:[#allocation8 + $0x380] ss:$16 sps:$4 sm:$0xff]   ;;  %v3307_v48 = vld [vmem:[#allocation8 + $0xec] ss:$16 sps:$4 sm:$0xff]  }
  0xdd   : > { %1373 = vmatprep.subr.bf16.mxu1 %v3247_v49  ;;  %v3376_v49 = vld [vmem:[#allocation8 + $0x364] ss:$16 sps:$4 sm:$0xff]  }
  0xdf   : > { %1301 = vmatpush2.bf16.msra.mxu0 %v3242_v50  ;;  %v3374_v50 = vld [vmem:[#allocation8 + $0x360] ss:$16 sps:$4 sm:$0xff]  }
  0xe0   : > { %1374 = vmatpush2.bf16.msra.mxu1 %v3245_v51  ;;  %1302 = vmatprep.subr.bf16.mxu0 %v3250_v52  ;;  %v3382_v51 = vld [vmem:[#allocation8 + $0x344] ss:$16 sps:$4 sm:$0xff]   ;;  %v3380_v52 = vld [vmem:[#allocation8 + $0x340] ss:$16 sps:$4 sm:$0xff]  }
  0xe1   : > { %1375 = vmatprep.subr.bf16.mxu1 %v3253_v55  ;;  %v3388_v55 = vld [vmem:[#allocation8 + $0x324] ss:$16 sps:$4 sm:$0xff]  }
  0xe3   : > { %1303 = vmatpush2.bf16.msra.mxu0 %v3248_v56  ;;  %v3386_v56 = vld [vmem:[#allocation8 + $0x320] ss:$16 sps:$4 sm:$0xff]  }
  0xe4   : > { %1376 = vmatpush2.bf16.msra.mxu1 %v3251_v57  ;;  %2256 = vmatprep.subr.bf16.mxu0 %v3256_v60  ;;  %v3394_v57 = vld [vmem:[#allocation8 + $0x304] ss:$16 sps:$4 sm:$0xff]   ;;  %v3392_v60 = vld [vmem:[#allocation8 + $0x300] ss:$16 sps:$4 sm:$0xff]  }
  0xe6   : > { %1305 = vmatmul.mubr.bf16.vlgmr.msra.gmra.mxu0 %v3837_v15  ;;  %v3263_v15 = vld [vmem:[#allocation8 + $0x80] ss:$16 sps:$4 sm:$0xff]  }
  0xe7   : > { %1378 = vmatmul.mubr.bf16.vlgmr.msra.gmra.mxu1 %v3839_v16  ;;  %1314 = vmatprep.mubr.bf16.mxu0 %v3844_v24  ;;  %v3268_v16 = vld [vmem:[#allocation8 + $0x64] ss:$16 sps:$4 sm:$0xff]   ;;  %v3266_v24 = vld [vmem:[#allocation8 + $0x60] ss:$16 sps:$4 sm:$0xff]  }
  0xe8   : > { %1387 = vmatprep.mubr.bf16.mxu1 %v3847_v26  ;;  %2257 = vmatpush1.bf16.msra.mxu0 %v3254_v61  ;;  %v3304_v26 = vld [vmem:[#allocation8 + $0x2e4] ss:$16 sps:$4 sm:$0xff]   ;;  %v3400_v61 = vld [vmem:[#allocation8 + $0x2ec] ss:$16 sps:$4 sm:$0xff]  }
  0xe9   : > { %2258 = vmatprep.subr.bf16.mxu0 %v3259_v62  ;;  %2329 = vmatprep.subr.bf16.mxu1 %v3304_v26  ;;  %v466_v62 = vlaneseq }
  0xea   : > { %2330 = vmatpush1.bf16.msra.mxu1 %v3302_v6 }
  0xec   : > { %2259 = vmatpush1.bf16.msra.mxu0 %v3257_v63  ;;  %v3918_v63 = vshrl.u32 %v466_v62, 7 }
  0xed   : > { %2260 = vmatprep.subr.bf16.mxu0 %v3262_v0 }
  0xee   : > { %1315 = vmatmul.mubr.bf16.gmra.mxu0 %v3857_v35  ;;  %v3269_v35 = vld [vmem:[#allocation8 + $0x40] ss:$16 sps:$4 sm:$0xff]   ;;  %v472_v0 = vsub.s32 1, %v3918_v63 }
  0xef   : > { %1388 = vmatmul.mubr.bf16.gmra.mxu1 %v3859_v36  ;;  %1324 = vmatprep.mubr.bf16.mxu0 %v3864_v44  ;;  %v3310_v36 = vld [vmem:[#allocation8 + $0x2c4] ss:$16 sps:$4 sm:$0xff]  }
  0xf0   : > { %1397 = vmatprep.mubr.bf16.mxu1 %v3868_v47  ;;  %2261 = vmatpush1.bf16.msra.mxu0 %v3260_v1  ;;  %v3274_v44 = vld [vmem:[#allocation8 + $0x24] ss:$16 sps:$4 sm:$0xff]   ;;  %v3308_v47 = vld [vmem:[#allocation8 + $0x2c0] ss:$16 sps:$4 sm:$0xff]   ;;  %v3921_v1 = vld [vmem:[#allocation7] sm:$0xf] }
  0xf1   : > { %2262 = vmatprep.subr.bf16.mxu0 %v3265_v3  ;;  %2331 = vmatprep.subr.bf16.mxu1 %v3310_v36  ;;  %v468_v3 = vsub.s32 0, %v3918_v63 }
  0xf2   : > { %2332 = vmatpush1.bf16.msra.mxu1 %v3308_v47 }
  0xf3   : > { %2333 = vmatprep.subr.bf16.mxu1 %v3316_v8 }
  0xf4   : > { %2263 = vmatpush1.bf16.msra.mxu0 %v3263_v15  ;;  %v3927_v15 = vrot.slane %v3921_v1, %v472_v0 }
  0xf5   : > { %2264 = vmatprep.subr.bf16.mxu0 %v3268_v16  ;;  %v3932_v16 = vrot.slane %v3921_v1, %v468_v3 }
  0xf6   : > { %1325 = vmatmul.mubr.bf16.gmra.mxu0 %v3878_v58  ;;  %v3277_v58 = vld [vmem:[#allocation8 + $0x4] ss:$16 sps:$4 sm:$0xff]   ;;  %2334 = vmatpush1.bf16.msra.mxu1 %v3314_v9 }
  0xf7   : > { %1398 = vmatmul.mubr.bf16.gmra.mxu1 %v3880_v59  ;;  %1334 = vmatprep.mubr.bf16.mxu0 %v3884_v2  ;;  %v3275_v59 = vld [vmem:[#allocation8] ss:$16 sps:$4 sm:$0xff]   ;;  %v3322_v2 = vld [vmem:[#allocation8 + $0x284] ss:$16 sps:$4 sm:$0xff]  }
  0xf8   : > { %1407 = vmatprep.mubr.bf16.mxu1 %v3888_v5  ;;  %2265 = vmatpush1.bf16.msra.mxu0 %v3266_v24  ;;  %v3280_v5 = vld [vmem:[#allocation8 + $0x1e4] ss:$16 sps:$4 sm:$0xff]  }
  0xf9   : > { %2266 = vmatprep.subr.bf16.mxu0 %v3271_v4  ;;  %2335 = vmatprep.subr.bf16.mxu1 %v3322_v2 }
  0xfa   : > { %2336 = vmatpush1.bf16.msra.mxu1 %v3320_v11 }
  0xfb   : > { %2337 = vmatprep.subr.bf16.mxu1 %v3328_v14 }
  0xfc   : > { %2267 = vmatpush1.bf16.msra.mxu0 %v3269_v35 }
  0xfd   : > { %2268 = vmatprep.subr.bf16.mxu0 %v3274_v44 }
  0xfe   : > { %1335 = vmatmul.mubr.bf16.gmra.mxu0 %v3896_v10  ;;  %v3281_v10 = vld [vmem:[#allocation8 + $0x1c0] ss:$16 sps:$4 sm:$0xff]   ;;  %2338 = vmatpush1.bf16.msra.mxu1 %v3326_v18 }
  0xff   : > { %1408 = vmatmul.mubr.bf16.gmra.mxu1 %v3898_v13  ;;  %v3334_v13 = vld [vmem:[#allocation8 + $0x244] ss:$16 sps:$4 sm:$0xff]  }
 0x100   : > { %2269 = vmatpush1.bf16.msra.mxu0 %v3272_v7  ;;  %2339 = vmatprep.subr.bf16.mxu1 %v3334_v13 }
 0x101   : > { %2270 = vmatprep.subr.bf16.mxu0 %v3277_v58 }
 0x102   : > { %2340 = vmatpush1.bf16.msra.mxu1 %v3332_v20 }
 0x103   : > { %2341 = vmatprep.subr.bf16.mxu1 %v3340_v22 }
 0x104   : > { %2271 = vmatpush1.bf16.msra.mxu0 %v3275_v59 }
 0x105   : > { %2272 = vmatprep.subr.bf16.mxu0 %v3280_v5 }
 0x106   : > { %2342 = vmatpush1.bf16.msra.mxu1 %v3338_v25 }
 0x107   : > { %2343 = vmatprep.subr.bf16.mxu1 %v3346_v27 }
 0x108   : > { %2273 = vmatpush2.bf16.msra.mxu0 %v3278_v12 }
 0x109   : > { %2274 = vmatprep.subr.bf16.mxu0 %v3283_v17 }
 0x10a   : > { %2344 = vmatpush1.bf16.msra.mxu1 %v3344_v29 }
 0x10b   : > { %2345 = vmatprep.subr.bf16.mxu1 %v3352_v31  ;;  %v3305_v31 = vld [vmem:[#allocation8 + $0xe8] ss:$16 sps:$4 sm:$0xff]  }
 0x10c   : > { %2275 = vmatpush2.bf16.msra.mxu0 %v3281_v10 }
 0x10d   : > { %2276 = vmatprep.subr.bf16.mxu0 %v3286_v19 }
 0x10e   : > { %2346 = vmatpush2.bf16.msra.mxu1 %v3350_v53 }
 0x10f   : > { %2347 = vmatprep.subr.bf16.mxu1 %v3358_v33  ;;  %v3313_v33 = vld [vmem:[#allocation8 + $0xcc] ss:$16 sps:$4 sm:$0xff]  }
 0x110   : > { %2277 = vmatpush2.bf16.msra.mxu0 %v3284_v21 }
 0x111   : > { %2278 = vmatprep.subr.bf16.mxu0 %v3289_v23 }
 0x112   : > { %2348 = vmatpush2.bf16.msra.mxu1 %v3356_v37 }
 0x113   : > { %2349 = vmatprep.subr.bf16.mxu1 %v3364_v39 }
 0x114   : > { %2279 = vmatpush2.bf16.msra.mxu0 %v3287_v28 }
 0x115   : > { %2280 = vmatprep.subr.bf16.mxu0 %v3292_v30 }
 0x116   : > { %2350 = vmatpush2.bf16.msra.mxu1 %v3362_v41 }
 0x117   : > { %2351 = vmatprep.subr.bf16.mxu1 %v3370_v43 }
 0x118   : > { %2281 = vmatpush2.bf16.msra.mxu0 %v3290_v32 }
 0x119   : > { %2282 = vmatprep.subr.bf16.mxu0 %v3295_v54 }
 0x11a   : > { %2352 = vmatpush2.bf16.msra.mxu1 %v3368_v46  ;;  %v3311_v46 = vld [vmem:[#allocation8 + $0xc8] ss:$16 sps:$4 sm:$0xff]  }
 0x11b   : > { %2353 = vmatprep.subr.bf16.mxu1 %v3376_v49 }
 0x11c   : > { %2283 = vmatpush2.bf16.msra.mxu0 %v3293_v34 }
 0x11d   : > { %2284 = vmatprep.subr.bf16.mxu0 %v3298_v38 }
 0x11e   : > { %2354 = vmatpush2.bf16.msra.mxu1 %v3374_v50  ;;  %v3319_v50 = vld [vmem:[#allocation8 + $0xac] ss:$16 sps:$4 sm:$0xff]  }
 0x11f   : > { %2355 = vmatprep.subr.bf16.mxu1 %v3382_v51 }
 0x120   : > { %2285 = vmatpush2.bf16.msra.mxu0 %v3296_v40 }
 0x121   : > { %2286 = vmatprep.subr.bf16.mxu0 %v3301_v42 }
 0x122   : > { %2356 = vmatpush2.bf16.msra.mxu1 %v3380_v52 }
 0x123   : > { %2357 = vmatprep.subr.bf16.mxu1 %v3388_v55 }
 0x124   : > { %2287 = vmatpush2.bf16.msra.mxu0 %v3299_v45 }
 0x125   : > { %2402 = vmatprep.subr.bf16.mxu0 %v3307_v48 }
 0x126   : > { %2358 = vmatpush2.bf16.msra.mxu1 %v3386_v56 }
 0x127   : > { %2359 = vmatprep.subr.bf16.mxu1 %v3394_v57 }
 0x12a   : > { %2360 = vmatpush2.bf16.msra.mxu1 %v3392_v60 }
 0x12b   : > { %2475 = vmatprep.subr.bf16.mxu1 %v3400_v61 }
 0x166   : > { %v1160_v24 = vpop.f32.mrf.mxu0 }
 0x167   : > { %v1233_v26 = vpop.f32.mrf.mxu1  ;;  %v1161_v36 = vadd.f32 %v1160_v24, %v3932_v16 }
 0x168   : > { %v1162_v4 = vpop.f32.mrf.mxu0 }
 0x169   : > { %v1235_v6 = vpop.f32.mrf.mxu1  ;;  %v1163_v35 = vadd.f32 %v1162_v4, %v3927_v15  ;;  %v1234_v5 = vadd.f32 %v1233_v26, %v1161_v36  ;;  %v3317_v26 = vld [vmem:[#allocation8 + $0xa8] ss:$16 sps:$4 sm:$0xff]  }
 0x16a   : > { %v1164_v44 = vpop.f32.mrf.mxu0 }
 0x16b   : > { %v1237_v47 = vpop.f32.mrf.mxu1  ;;  %v1165_v7 = vadd.f32 %v1164_v44, %v3932_v16  ;;  %v1236_v9 = vadd.f32 %v1235_v6, %v1163_v35  ;;  %v1418_v22 = vmax.f32 %v1234_v5, 0.0  ;;  %v3325_v35 = vld [vmem:[#allocation8 + $0x8c] ss:$16 sps:$4 sm:$0xff]   ;;  %v3323_v5 = vld [vmem:[#allocation8 + $0x88] ss:$16 sps:$4 sm:$0xff]  }
 0x16c   : > { %v1166_v8 = vpop.f32.mrf.mxu0 }
 0x16d   : > { %v1239_v58 = vpop.f32.mrf.mxu1  ;;  %v1238_v59 = vadd.f32 %v1237_v47, %v1165_v7  ;;  %v1167_v2 = vadd.f32 %v1166_v8, %v3927_v15  ;;  %v1419_v19 = vmax.f32 %v1236_v9, 0.0 }
 0x16e   : > { %v1170_v11 = vpop.f32.mrf.mxu0 }
 0x16f   : > { %v1243_v12 = vpop.f32.mrf.mxu1  ;;  %v1240_v14 = vadd.f32 %v1239_v58, %v1167_v2  ;;  %v1171_v17 = vadd.f32 %v1170_v11, %v3932_v16  ;;  %v1422_v18 = vmax.f32 %v1238_v59, 0.0 }
 0x170   : > { %v1172_v10 = vpop.f32.mrf.mxu0 }
 0x171   : > { %v1245_v13 = vpop.f32.mrf.mxu1  ;;  %v1423_v20 = vmax.f32 %v1240_v14, 0.0  ;;  %v1173_v21 = vadd.f32 %v1172_v10, %v3927_v15  ;;  %v1244_v23 = vadd.f32 %v1243_v12, %v1171_v17  ;;  %v3943_v32 = vpack.c.bf16 %v1422_v18, %v1418_v22  ;;  %v3331_v14 = vld [vmem:[#allocation8 + $0x6c] ss:$16 sps:$4 sm:$0xff]  }
 0x172   : > { %v1174_v25 = vpop.f32.mrf.mxu0 }
 0x173   : > { %v1247_v27 = vpop.f32.mrf.mxu1  ;;  %v3940_v28 = vpack.c.bf16 %v1423_v20, %v1419_v19  ;;  %v1175_v29 = vadd.f32 %v1174_v25, %v3932_v16  ;;  %v1246_v30 = vadd.f32 %v1245_v13, %v1173_v21  ;;  %v1426_v38 = vmax.f32 %v1244_v23, 0.0  ;;  %v3329_v25 = vld [vmem:[#allocation8 + $0x68] ss:$16 sps:$4 sm:$0xff]  }
 0x174   : > { %v1176_v53 = vpop.f32.mrf.mxu0 }
 0x175   : > { %v1249_v54 = vpop.f32.mrf.mxu1  ;;  %v1177_v34 = vadd.f32 %v1176_v53, %v3927_v15  ;;  %v1248_v37 = vadd.f32 %v1247_v27, %v1175_v29  ;;  %2288 = vmatprep.mubr.bf16.mxu0 %v3940_v28  ;;  %v1427_v41 = vmax.f32 %v1246_v30, 0.0  ;;  %v3337_v30 = vld [vmem:[#allocation8 + $0x4c] ss:$16 sps:$4 sm:$0xff]  }
 0x176   : > { %v1180_v39 = vpop.f32.mrf.mxu0  ;;  %2289 = vmatmul.mubr.bf16.vlgmr.msra.gmra.mxu0 %v3943_v32 }
 0x177   : > { %v1253_v40 = vpop.f32.mrf.mxu1  ;;  %v1430_v42 = vmax.f32 %v1248_v37, 0.0  ;;  %v1181_v43 = vadd.f32 %v1180_v39, %v3932_v16  ;;  %v1250_v45 = vadd.f32 %v1249_v54, %v1177_v34  ;;  %2403 = vmatpush1.bf16.msra.mxu0 %v3305_v31 }
 0x178   : > { %v1182_v48 = vpop.f32.mrf.mxu0  ;;  %2404 = vmatprep.subr.bf16.mxu0 %v3313_v33 }
 0x179   : > { %v1255_v49 = vpop.f32.mrf.mxu1  ;;  %v1431_v51 = vmax.f32 %v1250_v45, 0.0  ;;  %v1183_v52 = vadd.f32 %v1182_v48, %v3927_v15  ;;  %v3950_v55 = vpack.c.bf16 %v1430_v42, %v1426_v38  ;;  %v1254_v56 = vadd.f32 %v1253_v40, %v1181_v43  ;;  %v3343_v38 = vld [vmem:[#allocation8 + $0x2c] ss:$16 sps:$4 sm:$0xff]   ;;  %v3347_v43 = vld [vmem:[#allocation8 + $0x8] ss:$16 sps:$4 sm:$0xff]  }
 0x17a   : > { %v1184_v57 = vpop.f32.mrf.mxu0  ;;  %v3349_v42 = vld [vmem:[#allocation8 + $0xc] ss:$16 sps:$4 sm:$0xff]  }
 0x17b   : > { %v1257_v60 = vpop.f32.mrf.mxu1  ;;  %v3952_v61 = vpack.c.bf16 %v1431_v51, %v1427_v41  ;;  %v1185_v62 = vadd.f32 %v1184_v57, %v3932_v16  ;;  %v1256_v24 = vadd.f32 %v1255_v49, %v1183_v52  ;;  %2405 = vmatpush1.bf16.msra.mxu0 %v3311_v46  ;;  %v1434_v47 = vmax.f32 %v1254_v56, 0.0  ;;  %v3355_v45 = vld [vmem:[#allocation8 + $0x1ec] ss:$16 sps:$4 sm:$0xff]   ;;  %v3353_v46 = vld [vmem:[#allocation8 + $0x1e8] ss:$16 sps:$4 sm:$0xff]  }
 0x17c   : > { %v1186_v4 = vpop.f32.mrf.mxu0  ;;  %2406 = vmatprep.subr.bf16.mxu0 %v3319_v50  ;;  %v3361_v48 = vld [vmem:[#allocation8 + $0x1cc] ss:$16 sps:$4 sm:$0xff]   ;;  %v3359_v49 = vld [vmem:[#allocation8 + $0x1c8] ss:$16 sps:$4 sm:$0xff]  }
 0x17d   : > { %v1259_v6 = vpop.f32.mrf.mxu1  ;;  %v1187_v36 = vadd.f32 %v1186_v4, %v3927_v15  ;;  %v1258_v44 = vadd.f32 %v1257_v60, %v1185_v62  ;;  %2298 = vmatprep.mubr.bf16.mxu0 %v3952_v61  ;;  %v1435_v58 = vmax.f32 %v1256_v24, 0.0  ;;  %v3367_v50 = vld [vmem:[#allocation8 + $0x1ac] ss:$16 sps:$4 sm:$0xff]   ;;  %v3365_v51 = vld [vmem:[#allocation8 + $0x1a8] ss:$16 sps:$4 sm:$0xff]   ;;  %v476_v60 = vsub.s32 2, %v3918_v63 }
 0x17e   : > { %v1190_v7 = vpop.f32.mrf.mxu0  ;;  %2299 = vmatmul.mubr.bf16.gmra.mxu0 %v3950_v55  ;;  %v3373_v52 = vld [vmem:[#allocation8 + $0x18c] ss:$16 sps:$4 sm:$0xff]   ;;  %v3371_v56 = vld [vmem:[#allocation8 + $0x188] ss:$16 sps:$4 sm:$0xff]  }
 0x17f   : > { %v1263_v8 = vpop.f32.mrf.mxu1  ;;  %v1438_v9 = vmax.f32 %v1258_v44, 0.0  ;;  %v1191_v59 = vadd.f32 %v1190_v7, %v3932_v16  ;;  %v1260_v2 = vadd.f32 %v1259_v6, %v1187_v36  ;;  %2407 = vmatpush1.bf16.msra.mxu0 %v3317_v26  ;;  %v3379_v57 = vld [vmem:[#allocation8 + $0x16c] ss:$16 sps:$4 sm:$0xff]   ;;  %v3377_v62 = vld [vmem:[#allocation8 + $0x168] ss:$16 sps:$4 sm:$0xff]   ;;  %v3985_v4 = vrot.slane %v3921_v1, %v476_v60 }
 0x180   : > { %v1192_v11 = vpop.f32.mrf.mxu0  ;;  %2408 = vmatprep.subr.bf16.mxu0 %v3325_v35  ;;  %v3385_v24 = vld [vmem:[#allocation8 + $0x14c] ss:$16 sps:$4 sm:$0xff]   ;;  %v3383_v36 = vld [vmem:[#allocation8 + $0x148] ss:$16 sps:$4 sm:$0xff]  }
 0x181   : > { %v1265_v12 = vpop.f32.mrf.mxu1  ;;  %v1439_v17 = vmax.f32 %v1260_v2, 0.0  ;;  %v1193_v18 = vadd.f32 %v1192_v11, %v3927_v15  ;;  %v3960_v10 = vpack.c.bf16 %v1438_v9, %v1434_v47  ;;  %v1264_v13 = vadd.f32 %v1263_v8, %v1191_v59  ;;  %v3391_v7 = vld [vmem:[#allocation8 + $0x12c] ss:$16 sps:$4 sm:$0xff]  }
 0x182   : > { %v1194_v19 = vpop.f32.mrf.mxu0 }
 0x183   : > { %v1267_v20 = vpop.f32.mrf.mxu1  ;;  %v3962_v21 = vpack.c.bf16 %v1439_v17, %v1435_v58  ;;  %v1195_v22 = vadd.f32 %v1194_v19, %v3932_v16  ;;  %v1266_v23 = vadd.f32 %v1265_v12, %v1193_v18  ;;  %2409 = vmatpush1.bf16.msra.mxu0 %v3323_v5  ;;  %v1442_v54 = vmax.f32 %v1264_v13, 0.0  ;;  %v3335_v16 = vld [vmem:[#allocation8 + $0x48] ss:$16 sps:$4 sm:$0xff]   ;;  %v3397_v12 = vld [vmem:[#allocation8 + $0x10c] ss:$16 sps:$4 sm:$0xff]  }
 0x184   : > { %v1196_v27 = vpop.f32.mrf.mxu0  ;;  %2410 = vmatprep.subr.bf16.mxu0 %v3331_v14  ;;  %v3389_v5 = vld [vmem:[#allocation8 + $0x128] ss:$16 sps:$4 sm:$0xff]  }
 0x185   : > { %v1269_v29 = vpop.f32.mrf.mxu1  ;;  %v1197_v31 = vadd.f32 %v1196_v27, %v3927_v15  ;;  %v1268_v53 = vadd.f32 %v1267_v20, %v1195_v22  ;;  %2308 = vmatprep.mubr.bf16.mxu0 %v3962_v21  ;;  %v1443_v33 = vmax.f32 %v1266_v23, 0.0  ;;  %v3341_v15 = vld [vmem:[#allocation8 + $0x28] ss:$16 sps:$4 sm:$0xff]  }
 0x186   : > { %2309 = vmatmul.mubr.bf16.gmra.mxu0 %v3960_v10 }
 0x187   : > { %v1446_v34 = vmax.f32 %v1268_v53, 0.0  ;;  %v1270_v37 = vadd.f32 %v1269_v29, %v1197_v31  ;;  %2411 = vmatpush1.bf16.msra.mxu0 %v3329_v25  ;;  %v3395_v25 = vld [vmem:[#allocation8 + $0x108] ss:$16 sps:$4 sm:$0xff]  }
 0x188   : > { %2412 = vmatprep.subr.bf16.mxu0 %v3337_v30 }
 0x189   : > { %v1447_v39 = vmax.f32 %v1270_v37, 0.0  ;;  %v3968_v40 = vpack.c.bf16 %v1446_v34, %v1442_v54 }
 0x18b   : > { %v3970_v41 = vpack.c.bf16 %v1447_v39, %v1443_v33  ;;  %2413 = vmatpush1.bf16.msra.mxu0 %v3335_v16 }
 0x18c   : > { %2414 = vmatprep.subr.bf16.mxu0 %v3343_v38 }
 0x18d   : > { %2318 = vmatprep.mubr.bf16.mxu0 %v3970_v41 }
 0x18e   : > { %2319 = vmatmul.mubr.bf16.gmra.mxu0 %v3968_v40 }
 0x18f   : > { %2415 = vmatpush1.bf16.msra.mxu0 %v3341_v15  ;;  %2434 = vmatprep.mubr.bf16.mxu0 %v3940_v28  ;;  %v480_v28 = vsub.s32 3, %v3918_v63 }
 0x190   : > { %2416 = vmatprep.subr.bf16.mxu0 %v3349_v42  ;;  %v3398_v42 = vld [vmem:[#allocation8 + $0x2e8] ss:$16 sps:$4 sm:$0xff]  }
 0x191   : > { %v3980_v26 = vrot.slane %v3921_v1, %v480_v28 }
 0x193   : > { %2417 = vmatpush1.bf16.msra.mxu0 %v3347_v43 }
 0x194   : > { %2418 = vmatprep.subr.bf16.mxu0 %v3355_v45 }
 0x197   : > { %2419 = vmatpush2.bf16.msra.mxu0 %v3353_v46 }
 0x198   : > { %2420 = vmatprep.subr.bf16.mxu0 %v3361_v48  ;;  %v3403_v48 = vld [vmem:[#allocation8 + $0x2cc] ss:$16 sps:$4 sm:$0xff]  }
 0x19b   : > { %2421 = vmatpush2.bf16.msra.mxu0 %v3359_v49 }
 0x19c   : > { %2422 = vmatprep.subr.bf16.mxu0 %v3367_v50 }
 0x19f   : > { %2423 = vmatpush2.bf16.msra.mxu0 %v3365_v51 }
 0x1a0   : > { %2424 = vmatprep.subr.bf16.mxu0 %v3373_v52 }
 0x1a3   : > { %2425 = vmatpush2.bf16.msra.mxu0 %v3371_v56 }
 0x1a4   : > { %2426 = vmatprep.subr.bf16.mxu0 %v3379_v57 }
 0x1a6   : > { %v1306_v6 = vpop.f32.mrf.mxu0 }
 0x1a7   : > { %v1379_v35 = vpop.f32.mrf.mxu1  ;;  %2427 = vmatpush2.bf16.msra.mxu0 %v3377_v62  ;;  %v1307_v58 = vadd.f32 %v1306_v6, %v3985_v4 }
 0x1a8   : > { %v1308_v44 = vpop.f32.mrf.mxu0  ;;  %2428 = vmatprep.subr.bf16.mxu0 %v3385_v24 }
 0x1a9   : > { %v1381_v47 = vpop.f32.mrf.mxu1  ;;  %v1309_v8 = vadd.f32 %v1308_v44, %v3980_v26  ;;  %v1380_v13 = vadd.f32 %v1379_v35, %v1307_v58  ;;  %v3401_v35 = vld [vmem:[#allocation8 + $0x2c8] ss:$16 sps:$4 sm:$0xff]  }
 0x1aa   : > { %v1310_v9 = vpop.f32.mrf.mxu0 }
 0x1ab   : > { %v1383_v59 = vpop.f32.mrf.mxu1  ;;  %v1311_v2 = vadd.f32 %v1310_v9, %v3985_v4  ;;  %2429 = vmatpush2.bf16.msra.mxu0 %v3383_v36  ;;  %v1382_v14 = vadd.f32 %v1381_v47, %v1309_v8  ;;  %v1420_v33 = vmax.f32 %v1380_v13, 0.0  ;;  %v3406_v47 = vld [vmem:[#allocation8 + $0x2ac] ss:$16 sps:$4 sm:$0xff]  }
 0x1ac   : > { %v1312_v1 = vpop.f32.mrf.mxu0  ;;  %2430 = vmatprep.subr.bf16.mxu0 %v3391_v7 }
 0x1ad   : > { %v1385_v11 = vpop.f32.mrf.mxu1  ;;  %v1384_v17 = vadd.f32 %v1383_v59, %v1311_v2  ;;  %v1313_v18 = vadd.f32 %v1312_v1, %v3980_v26  ;;  %v1421_v31 = vmax.f32 %v1382_v14, 0.0  ;;  %v3409_v14 = vld [vmem:[#allocation8 + $0x28c] ss:$16 sps:$4 sm:$0xff]  }
 0x1ae   : > { %v1316_v19 = vpop.f32.mrf.mxu0 }
 0x1af   : > { %v1389_v20 = vpop.f32.mrf.mxu1  ;;  %v1386_v22 = vadd.f32 %v1385_v11, %v1313_v18  ;;  %v1317_v23 = vadd.f32 %v1316_v19, %v3985_v4  ;;  %2431 = vmatpush2.bf16.msra.mxu0 %v3389_v5  ;;  %v1424_v27 = vmax.f32 %v1384_v17, 0.0 }
 0x1b0   : > { %v1318_v29 = vpop.f32.mrf.mxu0  ;;  %2432 = vmatprep.subr.bf16.mxu0 %v3397_v12 }
 0x1b1   : > { %v1391_v30 = vpop.f32.mrf.mxu1  ;;  %v1425_v53 = vmax.f32 %v1386_v22, 0.0  ;;  %v1319_v54 = vadd.f32 %v1318_v29, %v3980_v26  ;;  %v1390_v34 = vadd.f32 %v1389_v20, %v1317_v23  ;;  %v3996_v43 = vpack.c.bf16 %v1424_v27, %v1420_v33  ;;  %v3407_v29 = vld [vmem:[#allocation8 + $0x288] ss:$16 sps:$4 sm:$0xff]  }
 0x1b2   : > { %v1320_v37 = vpop.f32.mrf.mxu0 }
 0x1b3   : > { %v1393_v16 = vpop.f32.mrf.mxu1  ;;  %v3993_v38 = vpack.c.bf16 %v1425_v53, %v1421_v31  ;;  %v1321_v39 = vadd.f32 %v1320_v37, %v3985_v4  ;;  %v1392_v15 = vadd.f32 %v1391_v30, %v1319_v54  ;;  %2433 = vmatpush2.bf16.msra.mxu0 %v3395_v25  ;;  %v1428_v51 = vmax.f32 %v1390_v34, 0.0  ;;  %v3412_v53 = vld [vmem:[#allocation8 + $0x26c] ss:$16 sps:$4 sm:$0xff]  }
 0x1b4   : > { %v1322_v45 = vpop.f32.mrf.mxu0 }
 0x1b5   : > { %v1395_v46 = vpop.f32.mrf.mxu1  ;;  %v1323_v49 = vadd.f32 %v1322_v45, %v3980_v26  ;;  %v1394_v50 = vadd.f32 %v1393_v16, %v1321_v39  ;;  %2361 = vmatprep.mubr.bf16.mxu1 %v3993_v38  ;;  %v1429_v57 = vmax.f32 %v1392_v15, 0.0 }
 0x1b6   : > { %2435 = vmatmul.mubr.bf16.vlgmr.msra.gmra.mxu0 %v3943_v32  ;;  %v1326_v52 = vpop.f32.mrf.mxu0  ;;  %2362 = vmatmul.mubr.bf16.vlgmr.msra.gmra.mxu1 %v3996_v43 }
 0x1b7   : > { %v1399_v56 = vpop.f32.mrf.mxu1  ;;  %v1432_v62 = vmax.f32 %v1394_v50, 0.0  ;;  %v1327_v24 = vadd.f32 %v1326_v52, %v3985_v4  ;;  %v1396_v6 = vadd.f32 %v1395_v46, %v1323_v49  ;;  %2444 = vmatprep.mubr.bf16.mxu0 %v3952_v61  ;;  %2476 = vmatpush1.bf16.msra.mxu1 %v3398_v42  ;;  %v3404_v61 = vld [vmem:[#allocation8 + $0x2a8] ss:$16 sps:$4 sm:$0xff]  }
 0x1b8   : > { %v1328_v36 = vpop.f32.mrf.mxu0  ;;  %2477 = vmatprep.subr.bf16.mxu1 %v3403_v48  ;;  %v3415_v48 = vld [vmem:[#allocation8 + $0x24c] ss:$16 sps:$4 sm:$0xff]  }
 0x1b9   : > { %v1401_v44 = vpop.f32.mrf.mxu1  ;;  %v1433_v7 = vmax.f32 %v1396_v6, 0.0  ;;  %v1329_v32 = vadd.f32 %v1328_v36, %v3980_v26  ;;  %v4005_v8 = vpack.c.bf16 %v1432_v62, %v1428_v51  ;;  %v1400_v58 = vadd.f32 %v1399_v56, %v1327_v24  ;;  %v3418_v62 = vld [vmem:[#allocation8 + $0x22c] ss:$16 sps:$4 sm:$0xff]  }
 0x1ba   : > { %v1330_v9 = vpop.f32.mrf.mxu0  ;;  %v3421_v36 = vld [vmem:[#allocation8 + $0x20c] ss:$16 sps:$4 sm:$0xff]  }
 0x1bb   : > { %v1403_v59 = vpop.f32.mrf.mxu1  ;;  %v4007_v2 = vpack.c.bf16 %v1433_v7, %v1429_v57  ;;  %v1331_v5 = vadd.f32 %v1330_v9, %v3985_v4  ;;  %v1402_v1 = vadd.f32 %v1401_v44, %v1329_v32  ;;  %2478 = vmatpush1.bf16.msra.mxu1 %v3401_v35  ;;  %v1436_v13 = vmax.f32 %v1400_v58, 0.0  ;;  %v3413_v57 = vld [vmem:[#allocation8 + $0x248] ss:$16 sps:$4 sm:$0xff]   ;;  %v3430_v32 = vld [vmem:[#allocation8 + $0x3ac] ss:$16 sps:$4 sm:$0xff]  }
 0x1bc   : > { %v1332_v11 = vpop.f32.mrf.mxu0  ;;  %2479 = vmatprep.subr.bf16.mxu1 %v3406_v47  ;;  %v3416_v35 = vld [vmem:[#allocation8 + $0x228] ss:$16 sps:$4 sm:$0xff]   ;;  %v3427_v47 = vld [vmem:[#allocation8 + $0x3cc] ss:$16 sps:$4 sm:$0xff]  }
 0x1bd   : > { %v1405_v12 = vpop.f32.mrf.mxu1  ;;  %v1333_v17 = vadd.f32 %v1332_v11, %v3980_v26  ;;  %v1404_v18 = vadd.f32 %v1403_v59, %v1331_v5  ;;  %2371 = vmatprep.mubr.bf16.mxu1 %v4007_v2  ;;  %v1437_v22 = vmax.f32 %v1402_v1, 0.0  ;;  %v3422_v44 = vld [vmem:[#allocation8 + $0x3e8] ss:$16 sps:$4 sm:$0xff]   ;;  %v3433_v9 = vld [vmem:[#allocation8 + $0x38c] ss:$16 sps:$4 sm:$0xff]  }
 0x1be   : > { %2445 = vmatmul.mubr.bf16.gmra.mxu0 %v3950_v55  ;;  %v1336_v19 = vpop.f32.mrf.mxu0  ;;  %2372 = vmatmul.mubr.bf16.gmra.mxu1 %v4005_v8  ;;  %v3425_v7 = vld [vmem:[#allocation8 + $0x3c8] ss:$16 sps:$4 sm:$0xff]   ;;  %v3436_v59 = vld [vmem:[#allocation8 + $0x36c] ss:$16 sps:$4 sm:$0xff]  }
 0x1bf   : > { %v1409_v20 = vpop.f32.mrf.mxu1  ;;  %v1440_v23 = vmax.f32 %v1404_v18, 0.0  ;;  %v1337_v25 = vadd.f32 %v1336_v19, %v3985_v4  ;;  %v1406_v27 = vadd.f32 %v1405_v12, %v1333_v17  ;;  %2454 = vmatprep.mubr.bf16.mxu0 %v3962_v21  ;;  %2480 = vmatpush1.bf16.msra.mxu1 %v3404_v61  ;;  %v3410_v21 = vld [vmem:[#allocation8 + $0x268] ss:$16 sps:$4 sm:$0xff]   ;;  %v3439_v5 = vld [vmem:[#allocation8 + $0x34c] ss:$16 sps:$4 sm:$0xff]  }
 0x1c0   : > { %v1338_v30 = vpop.f32.mrf.mxu0  ;;  %2481 = vmatprep.subr.bf16.mxu1 %v3409_v14  ;;  %v3428_v58 = vld [vmem:[#allocation8 + $0x3a8] ss:$16 sps:$4 sm:$0xff]   ;;  %v3442_v61 = vld [vmem:[#allocation8 + $0x32c] ss:$16 sps:$4 sm:$0xff]  }
 0x1c1   : > { %v1411_v31 = vpop.f32.mrf.mxu1  ;;  %v1441_v54 = vmax.f32 %v1406_v27, 0.0  ;;  %v1339_v55 = vadd.f32 %v1338_v30, %v3980_v26  ;;  %v4017_v33 = vpack.c.bf16 %v1440_v23, %v1436_v13  ;;  %v1410_v34 = vadd.f32 %v1409_v20, %v1337_v25  ;;  %v3437_v1 = vld [vmem:[#allocation8 + $0x348] ss:$16 sps:$4 sm:$0xff]   ;;  %v3445_v12 = vld [vmem:[#allocation8 + $0x30c] ss:$16 sps:$4 sm:$0xff]  }
 0x1c2   : > { %v1340_v37 = vpop.f32.mrf.mxu0  ;;  %v3440_v11 = vld [vmem:[#allocation8 + $0x328] ss:$16 sps:$4 sm:$0xff]  }
 0x1c3   : > { %v1413_v16 = vpop.f32.mrf.mxu1  ;;  %v4019_v39 = vpack.c.bf16 %v1441_v54, %v1437_v22  ;;  %v1341_v15 = vadd.f32 %v1340_v37, %v3985_v4  ;;  %v1412_v42 = vadd.f32 %v1411_v31, %v1339_v55  ;;  %2482 = vmatpush1.bf16.msra.mxu1 %v3407_v29  ;;  %v1444_v51 = vmax.f32 %v1410_v34, 0.0  ;;  %v3443_v14 = vld [vmem:[#allocation8 + $0x308] ss:$16 sps:$4 sm:$0xff]  }
 0x1c4   : > { %v1342_v45 = vpop.f32.mrf.mxu0  ;;  %2483 = vmatprep.subr.bf16.mxu1 %v3412_v53 }
 0x1c5   : > { %v1415_v46 = vpop.f32.mrf.mxu1  ;;  %v1343_v49 = vadd.f32 %v1342_v45, %v3980_v26  ;;  %v1414_v50 = vadd.f32 %v1413_v16, %v1341_v15  ;;  %2381 = vmatprep.mubr.bf16.mxu1 %v4019_v39  ;;  %v1445_v52 = vmax.f32 %v1412_v42, 0.0 }
 0x1c6   : > { %2455 = vmatmul.mubr.bf16.gmra.mxu0 %v3960_v10  ;;  %2382 = vmatmul.mubr.bf16.gmra.mxu1 %v4017_v33  ;;  %v3419_v10 = vld [vmem:[#allocation8 + $0x208] ss:$16 sps:$4 sm:$0xff]  }
 0x1c7   : > { %v1448_v56 = vmax.f32 %v1414_v50, 0.0  ;;  %v1416_v4 = vadd.f32 %v1415_v46, %v1343_v49  ;;  %2464 = vmatprep.mubr.bf16.mxu0 %v3970_v41  ;;  %2484 = vmatpush1.bf16.msra.mxu1 %v3410_v21  ;;  %v3424_v41 = vld [vmem:[#allocation8 + $0x3ec] ss:$16 sps:$4 sm:$0xff]  }
 0x1c8   : > { %2485 = vmatprep.subr.bf16.mxu1 %v3415_v48 }
 0x1c9   : > { %v1449_v24 = vmax.f32 %v1416_v4, 0.0  ;;  %v1464_v6 = vpack.c.bf16 %v1448_v56, %v1444_v51 }
 0x1cb   : > { %v1465_v26 = vpack.c.bf16 %v1449_v24, %v1445_v52  ;;  %2486 = vmatpush1.bf16.msra.mxu1 %v3413_v57 }
 0x1cc   : > { %2487 = vmatprep.subr.bf16.mxu1 %v3418_v62 }
 0x1cd   : > { %2391 = vmatprep.mubr.bf16.mxu1 %v1465_v26 }
 0x1ce   : > { %2465 = vmatmul.mubr.bf16.gmra.mxu0 %v3968_v40  ;;  %2392 = vmatmul.mubr.bf16.gmra.mxu1 %v1464_v6  ;;  %v3431_v40 = vld [vmem:[#allocation8 + $0x388] ss:$16 sps:$4 sm:$0xff]  }
 0x1cf   : > { %2488 = vmatpush1.bf16.msra.mxu1 %v3416_v35  ;;  %2507 = vmatprep.mubr.bf16.mxu1 %v3993_v38  ;;  %v3434_v38 = vld [vmem:[#allocation8 + $0x368] ss:$16 sps:$4 sm:$0xff]  }
 0x1d0   : > { %2489 = vmatprep.subr.bf16.mxu1 %v3421_v36 }
 0x1d3   : > { %2490 = vmatpush1.bf16.msra.mxu1 %v3419_v10 }
 0x1d4   : > { %2491 = vmatprep.subr.bf16.mxu1 %v3424_v41 }
 0x1d7   : > { %2492 = vmatpush2.bf16.msra.mxu1 %v3422_v44 }
 0x1d8   : > { %2493 = vmatprep.subr.bf16.mxu1 %v3427_v47 }
 0x1db   : > { %2494 = vmatpush2.bf16.msra.mxu1 %v3425_v7 }
 0x1dc   : > { %2495 = vmatprep.subr.bf16.mxu1 %v3430_v32 }
 0x1df   : > { %2496 = vmatpush2.bf16.msra.mxu1 %v3428_v58 }
 0x1e0   : > { %2497 = vmatprep.subr.bf16.mxu1 %v3433_v9 }
 0x1e3   : > { %2498 = vmatpush2.bf16.msra.mxu1 %v3431_v40 }
 0x1e4   : > { %2499 = vmatprep.subr.bf16.mxu1 %v3436_v59 }
 0x1e7   : > { %2500 = vmatpush2.bf16.msra.mxu1 %v3434_v38 }
 0x1e8   : > { %2501 = vmatprep.subr.bf16.mxu1 %v3439_v5 }
 0x1eb   : > { %2502 = vmatpush2.bf16.msra.mxu1 %v3437_v1 }
 0x1ec   : > { %2503 = vmatprep.subr.bf16.mxu1 %v3442_v61 }
 0x1ef   : > { %2504 = vmatpush2.bf16.msra.mxu1 %v3440_v11 }
 0x1f0   : > { %2505 = vmatprep.subr.bf16.mxu1 %v3445_v12 }
 0x1f3   : > { %2506 = vmatpush2.bf16.msra.mxu1 %v3443_v14 }
 0x1f6   : > { %2508 = vmatmul.mubr.bf16.vlgmr.msra.gmra.mxu1 %v3996_v43  ;;  %v4037_v43 = vld [vmem:[%s4181_s4] sm:$0xf] }
 0x1f7   : > { %2517 = vmatprep.mubr.bf16.mxu1 %v4007_v2  ;;  %v4042_v2 = vrot.slane %v4037_v43, %v468_v3  ;;  %v4047_v25 = vrot.slane %v4037_v43, %v472_v0 }
 0x1fe   : > { %2518 = vmatmul.mubr.bf16.gmra.mxu1 %v4005_v8 }
 0x1ff   : > { %2527 = vmatprep.mubr.bf16.mxu1 %v4019_v39 }
 0x206   : > { %2528 = vmatmul.mubr.bf16.gmra.mxu1 %v4017_v33 }
 0x207   : > { %2537 = vmatprep.mubr.bf16.mxu1 %v1465_v26 }
 0x20e   : > { %2538 = vmatmul.mubr.bf16.gmra.mxu1 %v1464_v6 }
 0x236   : > { %v2290_v17 = vpop.f32.mrf.mxu0 }
 0x237   : > { %v2291_v29 = vadd.f32 %v2290_v17, %v4042_v2 }
 0x238   : > { %v2292_v18 = vpop.f32.mrf.mxu0 }
 0x239   : > { %v2293_v31 = vadd.f32 %v2292_v18, %v4047_v25 }
 0x23a   : > { %v2294_v13 = vpop.f32.mrf.mxu0 }
 0x23b   : > { %v2295_v33 = vadd.f32 %v2294_v13, %v4042_v2 }
 0x23c   : > { %v2296_v19 = vpop.f32.mrf.mxu0 }
 0x23d   : > { %v2297_v34 = vadd.f32 %v2296_v19, %v4047_v25 }
 0x23e   : > { %v2300_v20 = vpop.f32.mrf.mxu0 }
 0x23f   : > { %v2301_v15 = vadd.f32 %v2300_v20, %v4042_v2 }
 0x240   : > { %v2302_v22 = vpop.f32.mrf.mxu0 }
 0x241   : > { %v2303_v45 = vadd.f32 %v2302_v22, %v4047_v25 }
 0x242   : > { %v2304_v23 = vpop.f32.mrf.mxu0 }
 0x243   : > { %v2305_v50 = vadd.f32 %v2304_v23, %v4042_v2 }
 0x244   : > { %v2306_v8 = vpop.f32.mrf.mxu0 }
 0x245   : > { %v2307_v56 = vadd.f32 %v2306_v8, %v4047_v25 }
 0x246   : > { %v2310_v27 = vpop.f32.mrf.mxu0 }
 0x247   : > { %v2311_v24 = vadd.f32 %v2310_v27, %v4042_v2 }
 0x248   : > { %v2312_v54 = vpop.f32.mrf.mxu0 }
 0x249   : > { %v2313_v35 = vadd.f32 %v2312_v54, %v4047_v25  ;;  %v4093_v54 = vrot.slane %v4037_v43, %v480_v28 }
 0x24a   : > { %v2314_v16 = vpop.f32.mrf.mxu0 }
 0x24b   : > { %v2315_v44 = vadd.f32 %v2314_v16, %v4042_v2 }
 0x24c   : > { %v2316_v48 = vpop.f32.mrf.mxu0 }
 0x24d   : > { %v2317_v32 = vadd.f32 %v2316_v48, %v4047_v25 }
 0x24e   : > { %v2320_v57 = vpop.f32.mrf.mxu0 }
 0x24f   : > { %v2321_v59 = vadd.f32 %v2320_v57, %v4042_v2 }
 0x250   : > { %v2322_v10 = vpop.f32.mrf.mxu0 }
 0x251   : > { %v2323_v1 = vadd.f32 %v2322_v10, %v4047_v25 }
 0x252   : > { %v2324_v9 = vpop.f32.mrf.mxu0 }
 0x253   : > { %v2325_v14 = vadd.f32 %v2324_v9, %v4042_v2 }
 0x254   : > { %v2326_v11 = vpop.f32.mrf.mxu0 }
 0x255   : > { %v2327_v13 = vadd.f32 %v2326_v11, %v4047_v25  ;;  %v4088_v25 = vrot.slane %v4037_v43, %v476_v60 }
 0x276   : > { %v2363_v30 = vpop.f32.mrf.mxu1  ;;  %v2436_v20 = vpop.f32.mrf.mxu0 }
 0x277   : > { %v2364_v53 = vadd.f32 %v2363_v30, %v2291_v29 }
 0x278   : > { %v2365_v55 = vpop.f32.mrf.mxu1  ;;  %v2438_v8 = vpop.f32.mrf.mxu0 }
 0x279   : > { %2548 = vst [vmem:[%s4054_s13] sm:$0xff] %v2364_v53  ;;  %v2366_v0 = vadd.f32 %v2365_v55, %v2293_v31 }
 0x27a   : > { %v2367_v3 = vpop.f32.mrf.mxu1  ;;  %v2440_v27 = vpop.f32.mrf.mxu0 }
 0x27b   : > { %2549 = vst [vmem:[%s4054_s13 + $0x8] sm:$0xff] %v2366_v0  ;;  %v2368_v37 = vadd.f32 %v2367_v3, %v2295_v33  ;;  %v2437_v33 = vadd.f32 %v2436_v20, %v4088_v25  ;;  %v2439_v3 = vadd.f32 %v2438_v8, %v4093_v54 }
 0x27c   : > { %v2369_v39 = vpop.f32.mrf.mxu1  ;;  %v2442_v29 = vpop.f32.mrf.mxu0 }
 0x27d   : > { %2552 = vst [vmem:[%s4054_s13 + $0x20] sm:$0xff] %v2368_v37  ;;  %v2370_v42 = vadd.f32 %v2369_v39, %v2297_v34  ;;  %v2441_v39 = vadd.f32 %v2440_v27, %v4088_v25  ;;  %v2443_v63 = vadd.f32 %v2442_v29, %v4093_v54 }
 0x27e   : > { %v2373_v21 = vpop.f32.mrf.mxu1  ;;  %v2446_v30 = vpop.f32.mrf.mxu0 }
 0x27f   : > { %2553 = vst [vmem:[%s4054_s13 + $0x28] sm:$0xff] %v2370_v42  ;;  %v2374_v46 = vadd.f32 %v2373_v21, %v2301_v15  ;;  %v2447_v21 = vadd.f32 %v2446_v30, %v4088_v25 }
 0x280   : > { %v2375_v49 = vpop.f32.mrf.mxu1  ;;  %v2448_v31 = vpop.f32.mrf.mxu0 }
 0x281   : > { %2556 = vst [vmem:[%s4054_s13 + $0x40] sm:$0xff] %v2374_v46  ;;  %v2376_v51 = vadd.f32 %v2375_v49, %v2303_v45  ;;  %v2449_v48 = vadd.f32 %v2448_v31, %v4093_v54 }
 0x282   : > { %v2377_v52 = vpop.f32.mrf.mxu1  ;;  %v2450_v53 = vpop.f32.mrf.mxu0 }
 0x283   : > { %2557 = vst [vmem:[%s4054_s13 + $0x48] sm:$0xff] %v2376_v51  ;;  %v2378_v4 = vadd.f32 %v2377_v52, %v2305_v50  ;;  %v2451_v52 = vadd.f32 %v2450_v53, %v4088_v25 }
 0x284   : > { %v2379_v62 = vpop.f32.mrf.mxu1  ;;  %v2452_v2 = vpop.f32.mrf.mxu0 }
 0x285   : > { %2560 = vst [vmem:[%s4054_s13 + $0x60] sm:$0xff] %v2378_v4  ;;  %v2380_v6 = vadd.f32 %v2379_v62, %v2307_v56  ;;  %v2453_v57 = vadd.f32 %v2452_v2, %v4093_v54 }
 0x286   : > { %v2383_v26 = vpop.f32.mrf.mxu1  ;;  %v2456_v55 = vpop.f32.mrf.mxu0 }
 0x287   : > { %2561 = vst [vmem:[%s4054_s13 + $0x68] sm:$0xff] %v2380_v6  ;;  %v2384_v36 = vadd.f32 %v2383_v26, %v2311_v24  ;;  %v2457_v26 = vadd.f32 %v2456_v55, %v4088_v25 }
 0x288   : > { %v2385_v41 = vpop.f32.mrf.mxu1  ;;  %v2458_v37 = vpop.f32.mrf.mxu0 }
 0x289   : > { %2564 = vst [vmem:[%s4054_s13 + $0x80] sm:$0xff] %v2384_v36  ;;  %v2386_v47 = vadd.f32 %v2385_v41, %v2313_v35  ;;  %v2459_v10 = vadd.f32 %v2458_v37, %v4093_v54 }
 0x28a   : > { %v2387_v7 = vpop.f32.mrf.mxu1  ;;  %v2460_v43 = vpop.f32.mrf.mxu0 }
 0x28b   : > { %2565 = vst [vmem:[%s4054_s13 + $0x88] sm:$0xff] %v2386_v47  ;;  %v2388_v58 = vadd.f32 %v2387_v7, %v2315_v44  ;;  %v2461_v7 = vadd.f32 %v2460_v43, %v4088_v25 }
 0x28c   : > { %v2389_v40 = vpop.f32.mrf.mxu1  ;;  %v2462_v50 = vpop.f32.mrf.mxu0 }
 0x28d   : > { %2568 = vst [vmem:[%s4054_s13 + $0xa0] sm:$0xff] %v2388_v58  ;;  %v2390_v38 = vadd.f32 %v2389_v40, %v2317_v32  ;;  %v2463_v9 = vadd.f32 %v2462_v50, %v4093_v54 }
 0x28e   : > { %v2393_v5 = vpop.f32.mrf.mxu1  ;;  %v2466_v24 = vpop.f32.mrf.mxu0 }
 0x28f   : > { %2569 = vst [vmem:[%s4054_s13 + $0xa8] sm:$0xff] %v2390_v38  ;;  %v2394_v61 = vadd.f32 %v2393_v5, %v2321_v59  ;;  %v2467_v5 = vadd.f32 %v2466_v24, %v4088_v25 }
 0x290   : > { %v2395_v12 = vpop.f32.mrf.mxu1  ;;  %v2468_v44 = vpop.f32.mrf.mxu0 }
 0x291   : > { %2572 = vst [vmem:[%s4054_s13 + $0xc0] sm:$0xff] %v2394_v61  ;;  %v2396_v17 = vadd.f32 %v2395_v12, %v2323_v1  ;;  %v2469_v11 = vadd.f32 %v2468_v44, %v4093_v54 }
 0x292   : > { %v2397_v18 = vpop.f32.mrf.mxu1  ;;  %v2470_v59 = vpop.f32.mrf.mxu0 }
 0x293   : > { %2573 = vst [vmem:[%s4054_s13 + $0xc8] sm:$0xff] %v2396_v17  ;;  %v2398_v19 = vadd.f32 %v2397_v18, %v2325_v14  ;;  %v2471_v18 = vadd.f32 %v2470_v59, %v4088_v25 }
 0x294   : > { %v2399_v22 = vpop.f32.mrf.mxu1  ;;  %v2472_v14 = vpop.f32.mrf.mxu0 }
 0x295   : > { %2576 = vst [vmem:[%s4054_s13 + $0xe0] sm:$0xff] %v2398_v19  ;;  %v2400_v23 = vadd.f32 %v2399_v22, %v2327_v13  ;;  %v2473_v20 = vadd.f32 %v2472_v14, %v4093_v54 }
 0x297   : > { %2577 = vst [vmem:[%s4054_s13 + $0xe8] sm:$0xff] %v2400_v23 }
 0x2b6   : > { %v2509_v0 = vpop.f32.mrf.mxu1 }
 0x2b7   : > { %v2510_v34 = vadd.f32 %v2509_v0, %v2437_v33 }
 0x2b8   : > { %v2511_v16 = vpop.f32.mrf.mxu1 }
 0x2b9   : > { %2550 = vst [vmem:[%s4054_s13 + $0x10] sm:$0xff] %v2510_v34  ;;  %v2512_v60 = vadd.f32 %v2511_v16, %v2439_v3 }
 0x2ba   : > { %v2513_v15 = vpop.f32.mrf.mxu1 }
 0x2bb   : > { %2551 = vst [vmem:[%s4054_s13 + $0x18] sm:$0xff] %v2512_v60  ;;  %v2514_v28 = vadd.f32 %v2513_v15, %v2441_v39 }
 0x2bc   : > { %v2515_v42 = vpop.f32.mrf.mxu1 }
 0x2bd   : > { %2554 = vst [vmem:[%s4054_s13 + $0x30] sm:$0xff] %v2514_v28  ;;  %v2516_v45 = vadd.f32 %v2515_v42, %v2443_v63 }
 0x2be   : > { %v2519_v46 = vpop.f32.mrf.mxu1 }
 0x2bf   : > { %2555 = vst [vmem:[%s4054_s13 + $0x38] sm:$0xff] %v2516_v45  ;;  %v2520_v49 = vadd.f32 %v2519_v46, %v2447_v21 }
 0x2c0   : > { %v2521_v51 = vpop.f32.mrf.mxu1 }
 0x2c1   : > { %2558 = vst [vmem:[%s4054_s13 + $0x50] sm:$0xff] %v2520_v49  ;;  %v2522_v56 = vadd.f32 %v2521_v51, %v2449_v48 }
 0x2c2   : > { %v2523_v4 = vpop.f32.mrf.mxu1 }
 0x2c3   : > { %2559 = vst [vmem:[%s4054_s13 + $0x58] sm:$0xff] %v2522_v56  ;;  %v2524_v62 = vadd.f32 %v2523_v4, %v2451_v52 }
 0x2c4   : > { %v2525_v6 = vpop.f32.mrf.mxu1 }
 0x2c5   : > { %2562 = vst [vmem:[%s4054_s13 + $0x70] sm:$0xff] %v2524_v62  ;;  %v2526_v35 = vadd.f32 %v2525_v6, %v2453_v57 }
 0x2c6   : > { %v2529_v36 = vpop.f32.mrf.mxu1 }
 0x2c7   : > { %2563 = vst [vmem:[%s4054_s13 + $0x78] sm:$0xff] %v2526_v35  ;;  %v2530_v41 = vadd.f32 %v2529_v36, %v2457_v26 }
 0x2c8   : > { %v2531_v47 = vpop.f32.mrf.mxu1 }
 0x2c9   : > { %2566 = vst [vmem:[%s4054_s13 + $0x90] sm:$0xff] %v2530_v41  ;;  %v2532_v32 = vadd.f32 %v2531_v47, %v2459_v10 }
 0x2ca   : > { %v2533_v58 = vpop.f32.mrf.mxu1 }
 0x2cb   : > { %2567 = vst [vmem:[%s4054_s13 + $0x98] sm:$0xff] %v2532_v32  ;;  %v2534_v40 = vadd.f32 %v2533_v58, %v2461_v7 }
 0x2cc   : > { %v2535_v38 = vpop.f32.mrf.mxu1 }
 0x2cd   : > { %2570 = vst [vmem:[%s4054_s13 + $0xb0] sm:$0xff] %v2534_v40  ;;  %v2536_v1 = vadd.f32 %v2535_v38, %v2463_v9 }
 0x2ce   : > { %v2539_v61 = vpop.f32.mrf.mxu1 }
 0x2cf   : > { %2571 = vst [vmem:[%s4054_s13 + $0xb8] sm:$0xff] %v2536_v1  ;;  %v2540_v12 = vadd.f32 %v2539_v61, %v2467_v5 }
 0x2d0   : > { %v2541_v17 = vpop.f32.mrf.mxu1 }
 0x2d1   : > { %2574 = vst [vmem:[%s4054_s13 + $0xd0] sm:$0xff] %v2540_v12  ;;  %v2542_v13 = vadd.f32 %v2541_v17, %v2469_v11 }
 0x2d2   : > { %v2543_v19 = vpop.f32.mrf.mxu1 }
 0x2d3   : > { %2575 = vst [vmem:[%s4054_s13 + $0xd8] sm:$0xff] %v2542_v13  ;;  %v2544_v22 = vadd.f32 %v2543_v19, %v2471_v18 }
 0x2d4   : > { %v2545_v23 = vpop.f32.mrf.mxu1 }
 0x2d5   : > { %2578 = vst [vmem:[%s4054_s13 + $0xf0] sm:$0xff] %v2544_v22  ;;  %v2546_v8 = vadd.f32 %v2545_v23, %v2473_v20 }
 0x2d7   : > { %2579 = vst [vmem:[%s4054_s13 + $0xf8] sm:$0xff] %v2546_v8 }
 0x2d8   : > { %3565 = shalt.err (!%p3562_p9)
}
 0x2d9   : > { %s3566_s29 = scalar_lea.hbm %s4130_s10, 4096  ;;  %s3570_s24 = scalar_lea.hbm %s4182_s5, 8192 }
 0x2da   : > { %p3567_p1 = scmp.ne.s32.totalorder %s4130_s10, %s3566_s29  ;;  %p3571_p11 = scmp.lt.s32.totalorder %s4130_s10, %s4182_s5 }
 0x2db   : > { %p3572_p13 = scmp.lt.s32.totalorder %s3570_s24, %s3566_s29 }
 0x2dc   : > { %p3568_p8 = pnand %p3567_p1, %p4200_p6 }
 0x2dd   : > { %p3573_p2 = por %p3572_p13, %p3571_p11 }
 0x2de   : > { %p3569_p10 = pneg %p3568_p8 }
 0x2e0   : > { %p3574_p4 = pnand %p3573_p2, %p3569_p10 }
 0x2e2   : > { %3577 = shalt.err (!%p3574_p4)
}
 0x2e3   : > { %s3635_s15 = smov 512   ;;  %s3636_s17 = smov 32  }
 0x2e4   : > { %2993 = dma.vmem_to_hbm [thread:$0]  (%p4200_p6), %s4132_s16, 4096, %s4130_s10, %s2581_s22, %s3635_s15, %s3635_s15, %s3636_s17  }
 0x2e5 PF: > { %s2610_s9 = sand.u32 1, %s3612_s18   ;;  %p4201_p12 = scmp.ne.s32.totalorder %s4188_s25, 0 }
 0x2e6   : > { %p4202_p0 = scmp.ge.s32.totalorder %s3624_s21, 2  ;;  %s2611_s11 = scalar_lea.sflag [#allocation4], %s2610_s9 }
 0x2e8   : > { %p3010_p5 = pnand %p4202_p0, %p4201_p12 }
 0x2ea   : > { %p3011_p3 = pneg %p3010_p5 }
 0x2ec   : > { %3607 = dma.done.wait (%p3011_p3), %s2611_s11, 4096  }
 0x2ed   : > { %3609 = vsyncadd (%p3011_p3), %s2611_s11, 4294963200  ;;  %p20_p7 = scmp.ge.s32.totalorder %s3747_s28, 4   ;;  %s4203_s18 = smov %s3616_s19 }
 0x2ee   : > { %s4204_s19 = smov %s3620_s20  ;;  %s4205_s20 = smov %s3757_s6 }
 0x2ef   : > { %s4206_s21 = smov %s3747_s28  ;;  %22 = sbr.rel (!%p20_p7) target bundleno = 7 (0x7), region = 97 }
 0x2f4   :  { %2616 = vsyncpa [#allocation3], 1 }
 0x2f5   :  { %2618 = vsyncpa [#allocation3 + $0x1], 1 }
 0x2f6   :  { %2619 = vsyncpa [#allocation6], 1 }
 0x2f7   :  { %2620 = vsyncpa [#allocation9], 1 }
 0x2f8   :  { %2621 = vsyncpa [#allocation4], 1 }
 0x2f9   :  { %2623 = vsyncpa [#allocation4 + $0x1], 1 }

</bundles_post_ra>
